<compile_context>
chip_gen: v5e
topology: v5e:2x2
jax: 0.10.0
libtpu: 0.0.40
codegen_flags: <defaults>
</compile_context>

<pallas_src>
import functools

import jax
import jax.numpy as jnp
from jax.experimental import pallas as pl
from jax.experimental.pallas import tpu as pltpu


def _round_up(x, m):
    return ((x + m - 1) // m) * m


def _layernorm(x, gamma, beta, eps=1e-5):
    # Two-pass (centered) LayerNorm, f32: matches PyTorch nn.LayerNorm numerics closely.
    mean = jnp.mean(x, axis=-1, keepdims=True)
    xc = x - mean
    var = jnp.mean(xc * xc, axis=-1, keepdims=True)
    return xc * jax.lax.rsqrt(var + eps) * gamma + beta


def layout_encoder_kernel(
    idx_ref, wgt_ref,                       # SMEM: flat (rows*64,) gather tables
    bbox_ref, feat_ref,
    wb_ref, bb_ref, gb_ref, betab_ref,
    w2_ref, b2_ref, g2_ref, beta2_ref,
    wa_ref, ba_ref, ga_ref, betaa_ref,
    out_ref,
    pooled_ref,                             # VMEM scratch (tile_m, 4*D)
    *, n_bins, taps_per_bin,
):
    tm, d = out_ref.shape
    n_tap = n_bins * taps_per_bin
    base = pl.program_id(0) * tm

    # ---- 2x2 RoIAlign as a gather: per box row and per bin, a weighted sum of 16
    #      feature rows (2x2 sample grid x 4 bilinear corners).  Indices/weights are
    #      scalars in SMEM; accumulation is f32 on the VPU; the 4 bins are written
    #      lane-concatenated (column = bin*D + d) to match the repacked roi_mlp weight.
    @pl.loop(0, tm)
    def _(m):
        jrow = (base + m) * n_tap
        accs = []
        for b4 in range(n_bins):
            acc = jnp.zeros((1, d), jnp.float32)
            for t in range(taps_per_bin):
                j = jrow + (b4 * taps_per_bin + t)
                w = wgt_ref[j]                                   # f32 scalar (SMEM)
                i = idx_ref[j]                                   # int32 scalar (SMEM)
                acc = acc + w * feat_ref[pl.ds(i, 1), :]         # (1, D) f32 FMA
            accs.append(acc)
        pooled_ref[pl.ds(m, 1), :] = jnp.concatenate(accs, axis=-1)

    # ---- bbox_mlp: one K=4 MXU push (dropout = identity, eval mode).
    hb = jnp.dot(bbox_ref[...], wb_ref[...],
                 preferred_element_type=jnp.float32) + bb_ref[...]
    bbox_feat = jnp.maximum(_layernorm(hb, gb_ref[...], betab_ref[...]), 0.0)

    # ---- roi_mlp: ONE (tile_m, 4D) @ (4D, D) matmul on the lane-concatenated bins.
    h2 = jnp.dot(pooled_ref[...].astype(w2_ref.dtype), w2_ref[...],
                 preferred_element_type=jnp.float32) + b2_ref[...]
    roi_feat = jnp.maximum(_layernorm(h2, g2_ref[...], beta2_ref[...]), 0.0)

    # ---- aggregation_mlp: ONE (tile_m, 2D) @ (2D, D) matmul on concat([bbox, roi]).
    cat = jnp.concatenate([bbox_feat, roi_feat], axis=-1).astype(wa_ref.dtype)
    h3 = jnp.dot(cat, wa_ref[...], preferred_element_type=jnp.float32) + ba_ref[...]
    out_ref[...] = jnp.maximum(_layernorm(h3, ga_ref[...], betaa_ref[...]), 0.0)


def roi_align_gather_tables(bboxes, H, W, pooled=2, sampling=2, scale=1.0):
    """Per-box gather tables reproducing torchvision.ops.RoIAlign(output_size=(2,2),
    spatial_scale=1.0, sampling_ratio=2, aligned=False).

    Returns:
      idx: (B*N, 64) int32 flat indices into the (B*H*W) flattened feature rows
      wgt: (B*N, 64) f32 bilinear weights (validity mask and 1/4 divisor folded in)
    ordered bin-major (bin = ph*2 + pw), then sample (iy*2 + ix), then corner.
    """
    B, N, _ = bboxes.shape
    x1 = bboxes[..., 0] * scale
    y1 = bboxes[..., 1] * scale
    x2 = bboxes[..., 2] * scale
    y2 = bboxes[..., 3] * scale
    roi_w = jnp.maximum(x2 - x1, 1.0)
    roi_h = jnp.maximum(y2 - y1, 1.0)
    bin_h = roi_h / pooled
    bin_w = roi_w / pooled

    sh = (B, N, 1, 1, 1, 1)
    y1 = y1.reshape(sh); x1 = x1.reshape(sh)
    bin_h = bin_h.reshape(sh); bin_w = bin_w.reshape(sh)
    ph = jnp.arange(pooled, dtype=jnp.float32).reshape(1, 1, pooled, 1, 1, 1)
    pw = jnp.arange(pooled, dtype=jnp.float32).reshape(1, 1, 1, pooled, 1, 1)
    iy = jnp.arange(sampling, dtype=jnp.float32).reshape(1, 1, 1, 1, sampling, 1)
    ix = jnp.arange(sampling, dtype=jnp.float32).reshape(1, 1, 1, 1, 1, sampling)

    y = y1 + ph * bin_h + (iy + 0.5) * bin_h / sampling
    x = x1 + pw * bin_w + (ix + 0.5) * bin_w / sampling
    full = (B, N, pooled, pooled, sampling, sampling)
    y = jnp.broadcast_to(y, full)
    x = jnp.broadcast_to(x, full)

    valid = (y >= -1.0) & (y <= H) & (x >= -1.0) & (x <= W)
    y = jnp.maximum(y, 0.0)
    x = jnp.maximum(x, 0.0)
    y_low = jnp.floor(y).astype(jnp.int32)
    x_low = jnp.floor(x).astype(jnp.int32)

    y_edge = y_low >= H - 1
    y_high = jnp.where(y_edge, H - 1, y_low + 1)
    y_low = jnp.where(y_edge, H - 1, y_low)
    y = jnp.where(y_edge, y_low.astype(jnp.float32), y)

    x_edge = x_low >= W - 1
    x_high = jnp.where(x_edge, W - 1, x_low + 1)
    x_low = jnp.where(x_edge, W - 1, x_low)
    x = jnp.where(x_edge, x_low.astype(jnp.float32), x)

    ly = y - y_low.astype(jnp.float32)
    lx = x - x_low.astype(jnp.float32)
    hy = 1.0 - ly
    hx = 1.0 - lx
    m = valid.astype(jnp.float32) / float(sampling * sampling)   # avg over sample grid

    boff = (jnp.arange(B, dtype=jnp.int32) * (H * W)).reshape(B, 1, 1, 1, 1, 1)

    def corner(w, yy, xx):
        return boff + yy * W + xx, w * m

    i1, w1 = corner(hy * hx, y_low, x_low)
    i2, w2 = corner(hy * lx, y_low, x_high)
    i3, w3 = corner(ly * hx, y_high, x_low)
    i4, w4 = corner(ly * lx, y_high, x_high)
    idx = jnp.stack([i1, i2, i3, i4], axis=-1)     # (B,N,ph,pw,iy,ix,4)
    wgt = jnp.stack([w1, w2, w3, w4], axis=-1)
    n_tap = pooled * pooled * sampling * sampling * 4
    return (idx.reshape(B * N, n_tap).astype(jnp.int32),
            wgt.reshape(B * N, n_tap).astype(jnp.float32))


def make_params(key, feature_dim):
    D = feature_dim
    ks = jax.random.split(key, 3)

    def lin(k, fan_in, fan_out):  # PyTorch nn.Linear default init
        bound = 1.0 / (fan_in ** 0.5)
        kw, kb = jax.random.split(k)
        w = jax.random.uniform(kw, (fan_out, fan_in), jnp.float32, -bound, bound)
        b = jax.random.uniform(kb, (fan_out,), jnp.float32, -bound, bound)
        return w, b

    Wb_pt, bb = lin(ks[0], 4, D)          # bbox_mlp linear (PyTorch layout (D, 4))
    Wr_pt, br = lin(ks[1], 4 * D, D)      # roi_mlp linear   (D, 4D)
    Wa_pt, ba = lin(ks[2], 2 * D, D)      # aggregation_mlp  (D, 2D)

    def ln():                              # separate affine params per LayerNorm
        return jnp.ones((1, D), jnp.float32), jnp.zeros((1, D), jnp.float32)

    gb, betab = ln()
    g2, beta2 = ln()
    ga, betaa = ln()

    # PyTorch roi_mlp consumes the (D, 2, 2) ROI flattened channel-major (idx = d*4 + bin);
    # repack to (4D, D) bin-major rows (row = bin*D + d_in) to match the kernel's
    # lane-concatenated pooled layout.
    w2 = Wr_pt.reshape(D, D, 4).transpose(2, 1, 0).reshape(4 * D, D)

    return dict(
        wb=Wb_pt.T,                        # (4, D)
        bb=bb.reshape(1, D), gb=gb, betab=betab,
        w2=w2,                             # (4D, D)
        b2=br.reshape(1, D), g2=g2, beta2=beta2,
        wa=Wa_pt.T,                        # (2D, D): rows [0,D)=bbox_feat, [D,2D)=roi_feat
        ba=ba.reshape(1, D), ga=ga, betaa=betaa,
    )


def layout_encoder(bboxes, visual_features, params, *, tile_m=None):
    B, N, _ = bboxes.shape
    HW, D = visual_features.shape[1], visual_features.shape[2]
    H = W = int(HW ** 0.5)
    BN = B * N

    # Host-side: small gather tables instead of a dense (B,4N,HW) bilinear matrix.
    idx, wgt = roi_align_gather_tables(bboxes, H, W)       # (BN, 64) each
    n_tap = idx.shape[1]

    bbox_flat = bboxes.reshape(BN, 4).astype(jnp.float32)
    feat_flat = visual_features.reshape(B * HW, D).astype(jnp.float32)

    # Row-tile the flattened (B*N) boxes; pad to a multiple of 8 (tile alignment).
    # Default collapses to one grid step for small B*N (v5e/v6e); on v7x pass
    # tile_m = round_up(BN, 8) // 2 to keep both TensorCores busy.
    if tile_m is None:
        tile_m = min(128, _round_up(BN, 8))
    tile_m = _round_up(tile_m, 8)
    bn_pad = _round_up(BN, tile_m)
    if bn_pad != BN:
        pad = bn_pad - BN
        bbox_flat = jnp.pad(bbox_flat, ((0, pad), (0, 0)))
        idx = jnp.pad(idx, ((0, pad), (0, 0)))
        wgt = jnp.pad(wgt, ((0, pad), (0, 0)))
    idx = idx.reshape(-1)                                   # (bn_pad*64,) -> SMEM
    wgt = wgt.reshape(-1)

    w2 = params["w2"].astype(jnp.bfloat16)
    wa = params["wa"].astype(jnp.bfloat16)

    grid = (bn_pad // tile_m,)

    def full(shape):
        nd = len(shape)
        return pl.BlockSpec(shape, lambda i: (0,) * nd)

    smem_spec = pl.BlockSpec(memory_space=pltpu.MemorySpace.SMEM)

    # VMEM budget from actual buffer totals (x2 for pipeline buffering) + headroom.
    block_bytes = (feat_flat.size * 4 + w2.size * 2 + wa.size * 2
                   + params["wb"].size * 4 + 9 * D * 4
                   + tile_m * 4 * 4 + tile_m * D * 4)
    scratch_bytes = tile_m * 4 * D * 4
    vmem_limit = int(2 * block_bytes + scratch_bytes + (16 << 20))

    kernel = functools.partial(layout_encoder_kernel, n_bins=4, taps_per_bin=n_tap // 4)

    out = pl.pallas_call(
        kernel,
        out_shape=jax.ShapeDtypeStruct((bn_pad, D), jnp.float32),
        grid_spec=pltpu.PrefetchScalarGridSpec(
            num_scalar_prefetch=0,
            grid=grid,
            in_specs=[
                smem_spec, smem_spec,                               # idx, wgt (SMEM)
                pl.BlockSpec((tile_m, 4), lambda i: (i, 0)),        # bbox row tile
                full((B * HW, D)),                                  # resident features
                full((4, D)), full((1, D)), full((1, D)), full((1, D)),
                full((4 * D, D)), full((1, D)), full((1, D)), full((1, D)),
                full((2 * D, D)), full((1, D)), full((1, D)), full((1, D)),
            ],
            out_specs=pl.BlockSpec((tile_m, D), lambda i: (i, 0)),
            scratch_shapes=[pltpu.VMEM((tile_m, 4 * D), jnp.float32)],
        ),
        compiler_params=pltpu.CompilerParams(
            dimension_semantics=("parallel",),
            vmem_limit_bytes=vmem_limit),
    )(idx, wgt, bbox_flat, feat_flat,
      params["wb"], params["bb"], params["gb"], params["betab"],
      w2, params["b2"], params["g2"], params["beta2"],
      wa, params["ba"], params["ga"], params["betaa"])

    return out[:BN].reshape(B, N, D)


if __name__ == "__main__":
    key = jax.random.PRNGKey(0)
    k_box, k_feat, k_par = jax.random.split(key, 3)

    B, N, D, H = 2, 8, 128, 8       # batch, boxes-per-image, feature_dim, H=W
    W = H

    # bboxes (x1, y1, x2, y2) inside the HxW feature-map coordinate frame
    pts = jax.random.uniform(k_box, (B, N, 2, 2), jnp.float32, 0.0, float(H))
    x1y1 = jnp.min(pts, axis=2)
    x2y2 = jnp.max(pts, axis=2)
    bboxes = jnp.concatenate([x1y1, x2y2], axis=-1)        # (B, N, 4)

    visual_features = jax.random.normal(k_feat, (B, H * W, D), jnp.float32)

    params = make_params(k_par, D)

    out = layout_encoder(bboxes, visual_features, params)
    jax.block_until_ready(out)
    assert out.shape == (B, N, D) and out.dtype == jnp.float32
    # TODO(synk): Dropout layers are treated as identity (eval-mode forward).
    print("KERNEL_OK")
</pallas_src>

<mosaic_0001>
module attributes {stable_mosaic.version = 11 : i64} {
  func.func @layout_encoder_kernel(%arg0: i32, %arg1: memref<1024xi32, #tpu.memory_space<smem>>, %arg2: memref<1024xf32, #tpu.memory_space<smem>>, %arg3: memref<16x4xf32, #tpu.memory_space<vmem>>, %arg4: memref<128x128xf32, #tpu.memory_space<vmem>>, %arg5: memref<4x128xf32, #tpu.memory_space<vmem>>, %arg6: memref<1x128xf32, #tpu.memory_space<vmem>>, %arg7: memref<1x128xf32, #tpu.memory_space<vmem>>, %arg8: memref<1x128xf32, #tpu.memory_space<vmem>>, %arg9: memref<512x128xbf16, #tpu.memory_space<vmem>>, %arg10: memref<1x128xf32, #tpu.memory_space<vmem>>, %arg11: memref<1x128xf32, #tpu.memory_space<vmem>>, %arg12: memref<1x128xf32, #tpu.memory_space<vmem>>, %arg13: memref<256x128xbf16, #tpu.memory_space<vmem>>, %arg14: memref<1x128xf32, #tpu.memory_space<vmem>>, %arg15: memref<1x128xf32, #tpu.memory_space<vmem>>, %arg16: memref<1x128xf32, #tpu.memory_space<vmem>>, %arg17: memref<16x128xf32, #tpu.memory_space<vmem>>, %arg18: memref<16x512xf32, #tpu.memory_space<vmem>>) attributes {dimension_semantics = [#tpu.dimension_semantics<parallel>], iteration_bounds = array<i64: 1>, scalar_prefetch = 0 : i64, scratch_operands = 1 : i64, tpu.core_type = #tpu.core_type<tc>, window_params = [{transform_indices = @transform_0, window_bounds = array<i64: 1024>}, {transform_indices = @transform_1, window_bounds = array<i64: 1024>}, {transform_indices = @transform_2, window_bounds = array<i64: 16, 4>}, {pipeline_mode = #tpu.pipeline_mode<synchronous>, transform_indices = @transform_3, window_bounds = array<i64: 128, 128>}, {pipeline_mode = #tpu.pipeline_mode<synchronous>, transform_indices = @transform_4, window_bounds = array<i64: 4, 128>}, {pipeline_mode = #tpu.pipeline_mode<synchronous>, transform_indices = @transform_5, window_bounds = array<i64: 1, 128>}, {pipeline_mode = #tpu.pipeline_mode<synchronous>, transform_indices = @transform_6, window_bounds = array<i64: 1, 128>}, {pipeline_mode = #tpu.pipeline_mode<synchronous>, transform_indices = @transform_7, window_bounds = array<i64: 1, 128>}, {pipeline_mode = #tpu.pipeline_mode<synchronous>, transform_indices = @transform_8, window_bounds = array<i64: 512, 128>}, {pipeline_mode = #tpu.pipeline_mode<synchronous>, transform_indices = @transform_9, window_bounds = array<i64: 1, 128>}, {pipeline_mode = #tpu.pipeline_mode<synchronous>, transform_indices = @transform_10, window_bounds = array<i64: 1, 128>}, {pipeline_mode = #tpu.pipeline_mode<synchronous>, transform_indices = @transform_11, window_bounds = array<i64: 1, 128>}, {pipeline_mode = #tpu.pipeline_mode<synchronous>, transform_indices = @transform_12, window_bounds = array<i64: 256, 128>}, {pipeline_mode = #tpu.pipeline_mode<synchronous>, transform_indices = @transform_13, window_bounds = array<i64: 1, 128>}, {pipeline_mode = #tpu.pipeline_mode<synchronous>, transform_indices = @transform_14, window_bounds = array<i64: 1, 128>}, {pipeline_mode = #tpu.pipeline_mode<synchronous>, transform_indices = @transform_15, window_bounds = array<i64: 1, 128>}, {transform_indices = @transform_16, window_bounds = array<i64: 16, 128>}]} {
    %c16_i32 = arith.constant 16 : i32
    %0 = arith.muli %arg0, %c16_i32 : i32
    %c0_i32 = arith.constant 0 : i32
    %c16_i32_0 = arith.constant 16 : i32
    %1 = arith.addi %c0_i32, %c16_i32_0 : i32
    %c1_i32 = arith.constant 1 : i32
    scf.for %arg19 = %c0_i32 to %1 step %c1_i32  : i32 {
      %c1_i32_51 = arith.constant 1 : i32
      %95 = arith.muli %arg19, %c1_i32_51 : i32
      %c0_i32_52 = arith.constant 0 : i32
      %96 = arith.addi %c0_i32_52, %95 : i32
      %97 = arith.addi %0, %96 : i32
      %c64_i32 = arith.constant 64 : i32
      %98 = arith.muli %97, %c64_i32 : i32
      %cst_53 = arith.constant 0.000000e+00 : f32
      %99 = vector.broadcast %cst_53 : f32 to vector<1x128xf32>
      %c0_i32_54 = arith.constant 0 : i32
      %100 = arith.addi %98, %c0_i32_54 : i32
      %101 = arith.index_cast %100 : i32 to index
      %102 = memref.load %arg2[%101] : memref<1024xf32, #tpu.memory_space<smem>>
      %103 = arith.index_cast %100 : i32 to index
      %104 = memref.load %arg1[%103] : memref<1024xi32, #tpu.memory_space<smem>>
      %105 = arith.index_cast %104 : i32 to index
      %c0_55 = arith.constant 0 : index
      %106 = vector.load %arg4[%105, %c0_55] : memref<128x128xf32, #tpu.memory_space<vmem>>, vector<1x128xf32>
      %107 = vector.broadcast %102 : f32 to vector<1x128xf32>
      %108 = arith.mulf %107, %106 : vector<1x128xf32>
      %109 = arith.addf %99, %108 : vector<1x128xf32>
      %c1_i32_56 = arith.constant 1 : i32
      %110 = arith.addi %98, %c1_i32_56 : i32
      %111 = arith.index_cast %110 : i32 to index
      %112 = memref.load %arg2[%111] : memref<1024xf32, #tpu.memory_space<smem>>
      %113 = arith.index_cast %110 : i32 to index
      %114 = memref.load %arg1[%113] : memref<1024xi32, #tpu.memory_space<smem>>
      %115 = arith.index_cast %114 : i32 to index
      %c0_57 = arith.constant 0 : index
      %116 = vector.load %arg4[%115, %c0_57] : memref<128x128xf32, #tpu.memory_space<vmem>>, vector<1x128xf32>
      %117 = vector.broadcast %112 : f32 to vector<1x128xf32>
      %118 = arith.mulf %117, %116 : vector<1x128xf32>
      %119 = arith.addf %109, %118 : vector<1x128xf32>
      %c2_i32 = arith.constant 2 : i32
      %120 = arith.addi %98, %c2_i32 : i32
      %121 = arith.index_cast %120 : i32 to index
      %122 = memref.load %arg2[%121] : memref<1024xf32, #tpu.memory_space<smem>>
      %123 = arith.index_cast %120 : i32 to index
      %124 = memref.load %arg1[%123] : memref<1024xi32, #tpu.memory_space<smem>>
      %125 = arith.index_cast %124 : i32 to index
      %c0_58 = arith.constant 0 : index
      %126 = vector.load %arg4[%125, %c0_58] : memref<128x128xf32, #tpu.memory_space<vmem>>, vector<1x128xf32>
      %127 = vector.broadcast %122 : f32 to vector<1x128xf32>
      %128 = arith.mulf %127, %126 : vector<1x128xf32>
      %129 = arith.addf %119, %128 : vector<1x128xf32>
      %c3_i32 = arith.constant 3 : i32
      %130 = arith.addi %98, %c3_i32 : i32
      %131 = arith.index_cast %130 : i32 to index
      %132 = memref.load %arg2[%131] : memref<1024xf32, #tpu.memory_space<smem>>
      %133 = arith.index_cast %130 : i32 to index
      %134 = memref.load %arg1[%133] : memref<1024xi32, #tpu.memory_space<smem>>
      %135 = arith.index_cast %134 : i32 to index
      %c0_59 = arith.constant 0 : index
      %136 = vector.load %arg4[%135, %c0_59] : memref<128x128xf32, #tpu.memory_space<vmem>>, vector<1x128xf32>
      %137 = vector.broadcast %132 : f32 to vector<1x128xf32>
      %138 = arith.mulf %137, %136 : vector<1x128xf32>
      %139 = arith.addf %129, %138 : vector<1x128xf32>
      %c4_i32 = arith.constant 4 : i32
      %140 = arith.addi %98, %c4_i32 : i32
      %141 = arith.index_cast %140 : i32 to index
      %142 = memref.load %arg2[%141] : memref<1024xf32, #tpu.memory_space<smem>>
      %143 = arith.index_cast %140 : i32 to index
      %144 = memref.load %arg1[%143] : memref<1024xi32, #tpu.memory_space<smem>>
      %145 = arith.index_cast %144 : i32 to index
      %c0_60 = arith.constant 0 : index
      %146 = vector.load %arg4[%145, %c0_60] : memref<128x128xf32, #tpu.memory_space<vmem>>, vector<1x128xf32>
      %147 = vector.broadcast %142 : f32 to vector<1x128xf32>
      %148 = arith.mulf %147, %146 : vector<1x128xf32>
      %149 = arith.addf %139, %148 : vector<1x128xf32>
      %c5_i32 = arith.constant 5 : i32
      %150 = arith.addi %98, %c5_i32 : i32
      %151 = arith.index_cast %150 : i32 to index
      %152 = memref.load %arg2[%151] : memref<1024xf32, #tpu.memory_space<smem>>
      %153 = arith.index_cast %150 : i32 to index
      %154 = memref.load %arg1[%153] : memref<1024xi32, #tpu.memory_space<smem>>
      %155 = arith.index_cast %154 : i32 to index
      %c0_61 = arith.constant 0 : index
      %156 = vector.load %arg4[%155, %c0_61] : memref<128x128xf32, #tpu.memory_space<vmem>>, vector<1x128xf32>
      %157 = vector.broadcast %152 : f32 to vector<1x128xf32>
      %158 = arith.mulf %157, %156 : vector<1x128xf32>
      %159 = arith.addf %149, %158 : vector<1x128xf32>
      %c6_i32 = arith.constant 6 : i32
      %160 = arith.addi %98, %c6_i32 : i32
      %161 = arith.index_cast %160 : i32 to index
      %162 = memref.load %arg2[%161] : memref<1024xf32, #tpu.memory_space<smem>>
      %163 = arith.index_cast %160 : i32 to index
      %164 = memref.load %arg1[%163] : memref<1024xi32, #tpu.memory_space<smem>>
      %165 = arith.index_cast %164 : i32 to index
      %c0_62 = arith.constant 0 : index
      %166 = vector.load %arg4[%165, %c0_62] : memref<128x128xf32, #tpu.memory_space<vmem>>, vector<1x128xf32>
      %167 = vector.broadcast %162 : f32 to vector<1x128xf32>
      %168 = arith.mulf %167, %166 : vector<1x128xf32>
      %169 = arith.addf %159, %168 : vector<1x128xf32>
      %c7_i32 = arith.constant 7 : i32
      %170 = arith.addi %98, %c7_i32 : i32
      %171 = arith.index_cast %170 : i32 to index
      %172 = memref.load %arg2[%171] : memref<1024xf32, #tpu.memory_space<smem>>
      %173 = arith.index_cast %170 : i32 to index
      %174 = memref.load %arg1[%173] : memref<1024xi32, #tpu.memory_space<smem>>
      %175 = arith.index_cast %174 : i32 to index
      %c0_63 = arith.constant 0 : index
      %176 = vector.load %arg4[%175, %c0_63] : memref<128x128xf32, #tpu.memory_space<vmem>>, vector<1x128xf32>
      %177 = vector.broadcast %172 : f32 to vector<1x128xf32>
      %178 = arith.mulf %177, %176 : vector<1x128xf32>
      %179 = arith.addf %169, %178 : vector<1x128xf32>
      %c8_i32 = arith.constant 8 : i32
      %180 = arith.addi %98, %c8_i32 : i32
      %181 = arith.index_cast %180 : i32 to index
      %182 = memref.load %arg2[%181] : memref<1024xf32, #tpu.memory_space<smem>>
      %183 = arith.index_cast %180 : i32 to index
      %184 = memref.load %arg1[%183] : memref<1024xi32, #tpu.memory_space<smem>>
      %185 = arith.index_cast %184 : i32 to index
      %c0_64 = arith.constant 0 : index
      %186 = vector.load %arg4[%185, %c0_64] : memref<128x128xf32, #tpu.memory_space<vmem>>, vector<1x128xf32>
      %187 = vector.broadcast %182 : f32 to vector<1x128xf32>
      %188 = arith.mulf %187, %186 : vector<1x128xf32>
      %189 = arith.addf %179, %188 : vector<1x128xf32>
      %c9_i32 = arith.constant 9 : i32
      %190 = arith.addi %98, %c9_i32 : i32
      %191 = arith.index_cast %190 : i32 to index
      %192 = memref.load %arg2[%191] : memref<1024xf32, #tpu.memory_space<smem>>
      %193 = arith.index_cast %190 : i32 to index
      %194 = memref.load %arg1[%193] : memref<1024xi32, #tpu.memory_space<smem>>
      %195 = arith.index_cast %194 : i32 to index
      %c0_65 = arith.constant 0 : index
      %196 = vector.load %arg4[%195, %c0_65] : memref<128x128xf32, #tpu.memory_space<vmem>>, vector<1x128xf32>
      %197 = vector.broadcast %192 : f32 to vector<1x128xf32>
      %198 = arith.mulf %197, %196 : vector<1x128xf32>
      %199 = arith.addf %189, %198 : vector<1x128xf32>
      %c10_i32 = arith.constant 10 : i32
      %200 = arith.addi %98, %c10_i32 : i32
      %201 = arith.index_cast %200 : i32 to index
      %202 = memref.load %arg2[%201] : memref<1024xf32, #tpu.memory_space<smem>>
      %203 = arith.index_cast %200 : i32 to index
      %204 = memref.load %arg1[%203] : memref<1024xi32, #tpu.memory_space<smem>>
      %205 = arith.index_cast %204 : i32 to index
      %c0_66 = arith.constant 0 : index
      %206 = vector.load %arg4[%205, %c0_66] : memref<128x128xf32, #tpu.memory_space<vmem>>, vector<1x128xf32>
      %207 = vector.broadcast %202 : f32 to vector<1x128xf32>
      %208 = arith.mulf %207, %206 : vector<1x128xf32>
      %209 = arith.addf %199, %208 : vector<1x128xf32>
      %c11_i32 = arith.constant 11 : i32
      %210 = arith.addi %98, %c11_i32 : i32
      %211 = arith.index_cast %210 : i32 to index
      %212 = memref.load %arg2[%211] : memref<1024xf32, #tpu.memory_space<smem>>
      %213 = arith.index_cast %210 : i32 to index
      %214 = memref.load %arg1[%213] : memref<1024xi32, #tpu.memory_space<smem>>
      %215 = arith.index_cast %214 : i32 to index
      %c0_67 = arith.constant 0 : index
      %216 = vector.load %arg4[%215, %c0_67] : memref<128x128xf32, #tpu.memory_space<vmem>>, vector<1x128xf32>
      %217 = vector.broadcast %212 : f32 to vector<1x128xf32>
      %218 = arith.mulf %217, %216 : vector<1x128xf32>
      %219 = arith.addf %209, %218 : vector<1x128xf32>
      %c12_i32 = arith.constant 12 : i32
      %220 = arith.addi %98, %c12_i32 : i32
      %221 = arith.index_cast %220 : i32 to index
      %222 = memref.load %arg2[%221] : memref<1024xf32, #tpu.memory_space<smem>>
      %223 = arith.index_cast %220 : i32 to index
      %224 = memref.load %arg1[%223] : memref<1024xi32, #tpu.memory_space<smem>>
      %225 = arith.index_cast %224 : i32 to index
      %c0_68 = arith.constant 0 : index
      %226 = vector.load %arg4[%225, %c0_68] : memref<128x128xf32, #tpu.memory_space<vmem>>, vector<1x128xf32>
      %227 = vector.broadcast %222 : f32 to vector<1x128xf32>
      %228 = arith.mulf %227, %226 : vector<1x128xf32>
      %229 = arith.addf %219, %228 : vector<1x128xf32>
      %c13_i32 = arith.constant 13 : i32
      %230 = arith.addi %98, %c13_i32 : i32
      %231 = arith.index_cast %230 : i32 to index
      %232 = memref.load %arg2[%231] : memref<1024xf32, #tpu.memory_space<smem>>
      %233 = arith.index_cast %230 : i32 to index
      %234 = memref.load %arg1[%233] : memref<1024xi32, #tpu.memory_space<smem>>
      %235 = arith.index_cast %234 : i32 to index
      %c0_69 = arith.constant 0 : index
      %236 = vector.load %arg4[%235, %c0_69] : memref<128x128xf32, #tpu.memory_space<vmem>>, vector<1x128xf32>
      %237 = vector.broadcast %232 : f32 to vector<1x128xf32>
      %238 = arith.mulf %237, %236 : vector<1x128xf32>
      %239 = arith.addf %229, %238 : vector<1x128xf32>
      %c14_i32 = arith.constant 14 : i32
      %240 = arith.addi %98, %c14_i32 : i32
      %241 = arith.index_cast %240 : i32 to index
      %242 = memref.load %arg2[%241] : memref<1024xf32, #tpu.memory_space<smem>>
      %243 = arith.index_cast %240 : i32 to index
      %244 = memref.load %arg1[%243] : memref<1024xi32, #tpu.memory_space<smem>>
      %245 = arith.index_cast %244 : i32 to index
      %c0_70 = arith.constant 0 : index
      %246 = vector.load %arg4[%245, %c0_70] : memref<128x128xf32, #tpu.memory_space<vmem>>, vector<1x128xf32>
      %247 = vector.broadcast %242 : f32 to vector<1x128xf32>
      %248 = arith.mulf %247, %246 : vector<1x128xf32>
      %249 = arith.addf %239, %248 : vector<1x128xf32>
      %c15_i32 = arith.constant 15 : i32
      %250 = arith.addi %98, %c15_i32 : i32
      %251 = arith.index_cast %250 : i32 to index
      %252 = memref.load %arg2[%251] : memref<1024xf32, #tpu.memory_space<smem>>
      %253 = arith.index_cast %250 : i32 to index
      %254 = memref.load %arg1[%253] : memref<1024xi32, #tpu.memory_space<smem>>
      %255 = arith.index_cast %254 : i32 to index
      %c0_71 = arith.constant 0 : index
      %256 = vector.load %arg4[%255, %c0_71] : memref<128x128xf32, #tpu.memory_space<vmem>>, vector<1x128xf32>
      %257 = vector.broadcast %252 : f32 to vector<1x128xf32>
      %258 = arith.mulf %257, %256 : vector<1x128xf32>
      %259 = arith.addf %249, %258 : vector<1x128xf32>
      %cst_72 = arith.constant 0.000000e+00 : f32
      %260 = vector.broadcast %cst_72 : f32 to vector<1x128xf32>
      %c16_i32_73 = arith.constant 16 : i32
      %261 = arith.addi %98, %c16_i32_73 : i32
      %262 = arith.index_cast %261 : i32 to index
      %263 = memref.load %arg2[%262] : memref<1024xf32, #tpu.memory_space<smem>>
      %264 = arith.index_cast %261 : i32 to index
      %265 = memref.load %arg1[%264] : memref<1024xi32, #tpu.memory_space<smem>>
      %266 = arith.index_cast %265 : i32 to index
      %c0_74 = arith.constant 0 : index
      %267 = vector.load %arg4[%266, %c0_74] : memref<128x128xf32, #tpu.memory_space<vmem>>, vector<1x128xf32>
      %268 = vector.broadcast %263 : f32 to vector<1x128xf32>
      %269 = arith.mulf %268, %267 : vector<1x128xf32>
      %270 = arith.addf %260, %269 : vector<1x128xf32>
      %c17_i32 = arith.constant 17 : i32
      %271 = arith.addi %98, %c17_i32 : i32
      %272 = arith.index_cast %271 : i32 to index
      %273 = memref.load %arg2[%272] : memref<1024xf32, #tpu.memory_space<smem>>
      %274 = arith.index_cast %271 : i32 to index
      %275 = memref.load %arg1[%274] : memref<1024xi32, #tpu.memory_space<smem>>
      %276 = arith.index_cast %275 : i32 to index
      %c0_75 = arith.constant 0 : index
      %277 = vector.load %arg4[%276, %c0_75] : memref<128x128xf32, #tpu.memory_space<vmem>>, vector<1x128xf32>
      %278 = vector.broadcast %273 : f32 to vector<1x128xf32>
      %279 = arith.mulf %278, %277 : vector<1x128xf32>
      %280 = arith.addf %270, %279 : vector<1x128xf32>
      %c18_i32 = arith.constant 18 : i32
      %281 = arith.addi %98, %c18_i32 : i32
      %282 = arith.index_cast %281 : i32 to index
      %283 = memref.load %arg2[%282] : memref<1024xf32, #tpu.memory_space<smem>>
      %284 = arith.index_cast %281 : i32 to index
      %285 = memref.load %arg1[%284] : memref<1024xi32, #tpu.memory_space<smem>>
      %286 = arith.index_cast %285 : i32 to index
      %c0_76 = arith.constant 0 : index
      %287 = vector.load %arg4[%286, %c0_76] : memref<128x128xf32, #tpu.memory_space<vmem>>, vector<1x128xf32>
      %288 = vector.broadcast %283 : f32 to vector<1x128xf32>
      %289 = arith.mulf %288, %287 : vector<1x128xf32>
      %290 = arith.addf %280, %289 : vector<1x128xf32>
      %c19_i32 = arith.constant 19 : i32
      %291 = arith.addi %98, %c19_i32 : i32
      %292 = arith.index_cast %291 : i32 to index
      %293 = memref.load %arg2[%292] : memref<1024xf32, #tpu.memory_space<smem>>
      %294 = arith.index_cast %291 : i32 to index
      %295 = memref.load %arg1[%294] : memref<1024xi32, #tpu.memory_space<smem>>
      %296 = arith.index_cast %295 : i32 to index
      %c0_77 = arith.constant 0 : index
      %297 = vector.load %arg4[%296, %c0_77] : memref<128x128xf32, #tpu.memory_space<vmem>>, vector<1x128xf32>
      %298 = vector.broadcast %293 : f32 to vector<1x128xf32>
      %299 = arith.mulf %298, %297 : vector<1x128xf32>
      %300 = arith.addf %290, %299 : vector<1x128xf32>
      %c20_i32 = arith.constant 20 : i32
      %301 = arith.addi %98, %c20_i32 : i32
      %302 = arith.index_cast %301 : i32 to index
      %303 = memref.load %arg2[%302] : memref<1024xf32, #tpu.memory_space<smem>>
      %304 = arith.index_cast %301 : i32 to index
      %305 = memref.load %arg1[%304] : memref<1024xi32, #tpu.memory_space<smem>>
      %306 = arith.index_cast %305 : i32 to index
      %c0_78 = arith.constant 0 : index
      %307 = vector.load %arg4[%306, %c0_78] : memref<128x128xf32, #tpu.memory_space<vmem>>, vector<1x128xf32>
      %308 = vector.broadcast %303 : f32 to vector<1x128xf32>
      %309 = arith.mulf %308, %307 : vector<1x128xf32>
      %310 = arith.addf %300, %309 : vector<1x128xf32>
      %c21_i32 = arith.constant 21 : i32
      %311 = arith.addi %98, %c21_i32 : i32
      %312 = arith.index_cast %311 : i32 to index
      %313 = memref.load %arg2[%312] : memref<1024xf32, #tpu.memory_space<smem>>
      %314 = arith.index_cast %311 : i32 to index
      %315 = memref.load %arg1[%314] : memref<1024xi32, #tpu.memory_space<smem>>
      %316 = arith.index_cast %315 : i32 to index
      %c0_79 = arith.constant 0 : index
      %317 = vector.load %arg4[%316, %c0_79] : memref<128x128xf32, #tpu.memory_space<vmem>>, vector<1x128xf32>
      %318 = vector.broadcast %313 : f32 to vector<1x128xf32>
      %319 = arith.mulf %318, %317 : vector<1x128xf32>
      %320 = arith.addf %310, %319 : vector<1x128xf32>
      %c22_i32 = arith.constant 22 : i32
      %321 = arith.addi %98, %c22_i32 : i32
      %322 = arith.index_cast %321 : i32 to index
      %323 = memref.load %arg2[%322] : memref<1024xf32, #tpu.memory_space<smem>>
      %324 = arith.index_cast %321 : i32 to index
      %325 = memref.load %arg1[%324] : memref<1024xi32, #tpu.memory_space<smem>>
      %326 = arith.index_cast %325 : i32 to index
      %c0_80 = arith.constant 0 : index
      %327 = vector.load %arg4[%326, %c0_80] : memref<128x128xf32, #tpu.memory_space<vmem>>, vector<1x128xf32>
      %328 = vector.broadcast %323 : f32 to vector<1x128xf32>
      %329 = arith.mulf %328, %327 : vector<1x128xf32>
      %330 = arith.addf %320, %329 : vector<1x128xf32>
      %c23_i32 = arith.constant 23 : i32
      %331 = arith.addi %98, %c23_i32 : i32
      %332 = arith.index_cast %331 : i32 to index
      %333 = memref.load %arg2[%332] : memref<1024xf32, #tpu.memory_space<smem>>
      %334 = arith.index_cast %331 : i32 to index
      %335 = memref.load %arg1[%334] : memref<1024xi32, #tpu.memory_space<smem>>
      %336 = arith.index_cast %335 : i32 to index
      %c0_81 = arith.constant 0 : index
      %337 = vector.load %arg4[%336, %c0_81] : memref<128x128xf32, #tpu.memory_space<vmem>>, vector<1x128xf32>
      %338 = vector.broadcast %333 : f32 to vector<1x128xf32>
      %339 = arith.mulf %338, %337 : vector<1x128xf32>
      %340 = arith.addf %330, %339 : vector<1x128xf32>
      %c24_i32 = arith.constant 24 : i32
      %341 = arith.addi %98, %c24_i32 : i32
      %342 = arith.index_cast %341 : i32 to index
      %343 = memref.load %arg2[%342] : memref<1024xf32, #tpu.memory_space<smem>>
      %344 = arith.index_cast %341 : i32 to index
      %345 = memref.load %arg1[%344] : memref<1024xi32, #tpu.memory_space<smem>>
      %346 = arith.index_cast %345 : i32 to index
      %c0_82 = arith.constant 0 : index
      %347 = vector.load %arg4[%346, %c0_82] : memref<128x128xf32, #tpu.memory_space<vmem>>, vector<1x128xf32>
      %348 = vector.broadcast %343 : f32 to vector<1x128xf32>
      %349 = arith.mulf %348, %347 : vector<1x128xf32>
      %350 = arith.addf %340, %349 : vector<1x128xf32>
      %c25_i32 = arith.constant 25 : i32
      %351 = arith.addi %98, %c25_i32 : i32
      %352 = arith.index_cast %351 : i32 to index
      %353 = memref.load %arg2[%352] : memref<1024xf32, #tpu.memory_space<smem>>
      %354 = arith.index_cast %351 : i32 to index
      %355 = memref.load %arg1[%354] : memref<1024xi32, #tpu.memory_space<smem>>
      %356 = arith.index_cast %355 : i32 to index
      %c0_83 = arith.constant 0 : index
      %357 = vector.load %arg4[%356, %c0_83] : memref<128x128xf32, #tpu.memory_space<vmem>>, vector<1x128xf32>
      %358 = vector.broadcast %353 : f32 to vector<1x128xf32>
      %359 = arith.mulf %358, %357 : vector<1x128xf32>
      %360 = arith.addf %350, %359 : vector<1x128xf32>
      %c26_i32 = arith.constant 26 : i32
      %361 = arith.addi %98, %c26_i32 : i32
      %362 = arith.index_cast %361 : i32 to index
      %363 = memref.load %arg2[%362] : memref<1024xf32, #tpu.memory_space<smem>>
      %364 = arith.index_cast %361 : i32 to index
      %365 = memref.load %arg1[%364] : memref<1024xi32, #tpu.memory_space<smem>>
      %366 = arith.index_cast %365 : i32 to index
      %c0_84 = arith.constant 0 : index
      %367 = vector.load %arg4[%366, %c0_84] : memref<128x128xf32, #tpu.memory_space<vmem>>, vector<1x128xf32>
      %368 = vector.broadcast %363 : f32 to vector<1x128xf32>
      %369 = arith.mulf %368, %367 : vector<1x128xf32>
      %370 = arith.addf %360, %369 : vector<1x128xf32>
      %c27_i32 = arith.constant 27 : i32
      %371 = arith.addi %98, %c27_i32 : i32
      %372 = arith.index_cast %371 : i32 to index
      %373 = memref.load %arg2[%372] : memref<1024xf32, #tpu.memory_space<smem>>
      %374 = arith.index_cast %371 : i32 to index
      %375 = memref.load %arg1[%374] : memref<1024xi32, #tpu.memory_space<smem>>
      %376 = arith.index_cast %375 : i32 to index
      %c0_85 = arith.constant 0 : index
      %377 = vector.load %arg4[%376, %c0_85] : memref<128x128xf32, #tpu.memory_space<vmem>>, vector<1x128xf32>
      %378 = vector.broadcast %373 : f32 to vector<1x128xf32>
      %379 = arith.mulf %378, %377 : vector<1x128xf32>
      %380 = arith.addf %370, %379 : vector<1x128xf32>
      %c28_i32 = arith.constant 28 : i32
      %381 = arith.addi %98, %c28_i32 : i32
      %382 = arith.index_cast %381 : i32 to index
      %383 = memref.load %arg2[%382] : memref<1024xf32, #tpu.memory_space<smem>>
      %384 = arith.index_cast %381 : i32 to index
      %385 = memref.load %arg1[%384] : memref<1024xi32, #tpu.memory_space<smem>>
      %386 = arith.index_cast %385 : i32 to index
      %c0_86 = arith.constant 0 : index
      %387 = vector.load %arg4[%386, %c0_86] : memref<128x128xf32, #tpu.memory_space<vmem>>, vector<1x128xf32>
      %388 = vector.broadcast %383 : f32 to vector<1x128xf32>
      %389 = arith.mulf %388, %387 : vector<1x128xf32>
      %390 = arith.addf %380, %389 : vector<1x128xf32>
      %c29_i32 = arith.constant 29 : i32
      %391 = arith.addi %98, %c29_i32 : i32
      %392 = arith.index_cast %391 : i32 to index
      %393 = memref.load %arg2[%392] : memref<1024xf32, #tpu.memory_space<smem>>
      %394 = arith.index_cast %391 : i32 to index
      %395 = memref.load %arg1[%394] : memref<1024xi32, #tpu.memory_space<smem>>
      %396 = arith.index_cast %395 : i32 to index
      %c0_87 = arith.constant 0 : index
      %397 = vector.load %arg4[%396, %c0_87] : memref<128x128xf32, #tpu.memory_space<vmem>>, vector<1x128xf32>
      %398 = vector.broadcast %393 : f32 to vector<1x128xf32>
      %399 = arith.mulf %398, %397 : vector<1x128xf32>
      %400 = arith.addf %390, %399 : vector<1x128xf32>
      %c30_i32 = arith.constant 30 : i32
      %401 = arith.addi %98, %c30_i32 : i32
      %402 = arith.index_cast %401 : i32 to index
      %403 = memref.load %arg2[%402] : memref<1024xf32, #tpu.memory_space<smem>>
      %404 = arith.index_cast %401 : i32 to index
      %405 = memref.load %arg1[%404] : memref<1024xi32, #tpu.memory_space<smem>>
      %406 = arith.index_cast %405 : i32 to index
      %c0_88 = arith.constant 0 : index
      %407 = vector.load %arg4[%406, %c0_88] : memref<128x128xf32, #tpu.memory_space<vmem>>, vector<1x128xf32>
      %408 = vector.broadcast %403 : f32 to vector<1x128xf32>
      %409 = arith.mulf %408, %407 : vector<1x128xf32>
      %410 = arith.addf %400, %409 : vector<1x128xf32>
      %c31_i32 = arith.constant 31 : i32
      %411 = arith.addi %98, %c31_i32 : i32
      %412 = arith.index_cast %411 : i32 to index
      %413 = memref.load %arg2[%412] : memref<1024xf32, #tpu.memory_space<smem>>
      %414 = arith.index_cast %411 : i32 to index
      %415 = memref.load %arg1[%414] : memref<1024xi32, #tpu.memory_space<smem>>
      %416 = arith.index_cast %415 : i32 to index
      %c0_89 = arith.constant 0 : index
      %417 = vector.load %arg4[%416, %c0_89] : memref<128x128xf32, #tpu.memory_space<vmem>>, vector<1x128xf32>
      %418 = vector.broadcast %413 : f32 to vector<1x128xf32>
      %419 = arith.mulf %418, %417 : vector<1x128xf32>
      %420 = arith.addf %410, %419 : vector<1x128xf32>
      %cst_90 = arith.constant 0.000000e+00 : f32
      %421 = vector.broadcast %cst_90 : f32 to vector<1x128xf32>
      %c32_i32 = arith.constant 32 : i32
      %422 = arith.addi %98, %c32_i32 : i32
      %423 = arith.index_cast %422 : i32 to index
      %424 = memref.load %arg2[%423] : memref<1024xf32, #tpu.memory_space<smem>>
      %425 = arith.index_cast %422 : i32 to index
      %426 = memref.load %arg1[%425] : memref<1024xi32, #tpu.memory_space<smem>>
      %427 = arith.index_cast %426 : i32 to index
      %c0_91 = arith.constant 0 : index
      %428 = vector.load %arg4[%427, %c0_91] : memref<128x128xf32, #tpu.memory_space<vmem>>, vector<1x128xf32>
      %429 = vector.broadcast %424 : f32 to vector<1x128xf32>
      %430 = arith.mulf %429, %428 : vector<1x128xf32>
      %431 = arith.addf %421, %430 : vector<1x128xf32>
      %c33_i32 = arith.constant 33 : i32
      %432 = arith.addi %98, %c33_i32 : i32
      %433 = arith.index_cast %432 : i32 to index
      %434 = memref.load %arg2[%433] : memref<1024xf32, #tpu.memory_space<smem>>
      %435 = arith.index_cast %432 : i32 to index
      %436 = memref.load %arg1[%435] : memref<1024xi32, #tpu.memory_space<smem>>
      %437 = arith.index_cast %436 : i32 to index
      %c0_92 = arith.constant 0 : index
      %438 = vector.load %arg4[%437, %c0_92] : memref<128x128xf32, #tpu.memory_space<vmem>>, vector<1x128xf32>
      %439 = vector.broadcast %434 : f32 to vector<1x128xf32>
      %440 = arith.mulf %439, %438 : vector<1x128xf32>
      %441 = arith.addf %431, %440 : vector<1x128xf32>
      %c34_i32 = arith.constant 34 : i32
      %442 = arith.addi %98, %c34_i32 : i32
      %443 = arith.index_cast %442 : i32 to index
      %444 = memref.load %arg2[%443] : memref<1024xf32, #tpu.memory_space<smem>>
      %445 = arith.index_cast %442 : i32 to index
      %446 = memref.load %arg1[%445] : memref<1024xi32, #tpu.memory_space<smem>>
      %447 = arith.index_cast %446 : i32 to index
      %c0_93 = arith.constant 0 : index
      %448 = vector.load %arg4[%447, %c0_93] : memref<128x128xf32, #tpu.memory_space<vmem>>, vector<1x128xf32>
      %449 = vector.broadcast %444 : f32 to vector<1x128xf32>
      %450 = arith.mulf %449, %448 : vector<1x128xf32>
      %451 = arith.addf %441, %450 : vector<1x128xf32>
      %c35_i32 = arith.constant 35 : i32
      %452 = arith.addi %98, %c35_i32 : i32
      %453 = arith.index_cast %452 : i32 to index
      %454 = memref.load %arg2[%453] : memref<1024xf32, #tpu.memory_space<smem>>
      %455 = arith.index_cast %452 : i32 to index
      %456 = memref.load %arg1[%455] : memref<1024xi32, #tpu.memory_space<smem>>
      %457 = arith.index_cast %456 : i32 to index
      %c0_94 = arith.constant 0 : index
      %458 = vector.load %arg4[%457, %c0_94] : memref<128x128xf32, #tpu.memory_space<vmem>>, vector<1x128xf32>
      %459 = vector.broadcast %454 : f32 to vector<1x128xf32>
      %460 = arith.mulf %459, %458 : vector<1x128xf32>
      %461 = arith.addf %451, %460 : vector<1x128xf32>
      %c36_i32 = arith.constant 36 : i32
      %462 = arith.addi %98, %c36_i32 : i32
      %463 = arith.index_cast %462 : i32 to index
      %464 = memref.load %arg2[%463] : memref<1024xf32, #tpu.memory_space<smem>>
      %465 = arith.index_cast %462 : i32 to index
      %466 = memref.load %arg1[%465] : memref<1024xi32, #tpu.memory_space<smem>>
      %467 = arith.index_cast %466 : i32 to index
      %c0_95 = arith.constant 0 : index
      %468 = vector.load %arg4[%467, %c0_95] : memref<128x128xf32, #tpu.memory_space<vmem>>, vector<1x128xf32>
      %469 = vector.broadcast %464 : f32 to vector<1x128xf32>
      %470 = arith.mulf %469, %468 : vector<1x128xf32>
      %471 = arith.addf %461, %470 : vector<1x128xf32>
      %c37_i32 = arith.constant 37 : i32
      %472 = arith.addi %98, %c37_i32 : i32
      %473 = arith.index_cast %472 : i32 to index
      %474 = memref.load %arg2[%473] : memref<1024xf32, #tpu.memory_space<smem>>
      %475 = arith.index_cast %472 : i32 to index
      %476 = memref.load %arg1[%475] : memref<1024xi32, #tpu.memory_space<smem>>
      %477 = arith.index_cast %476 : i32 to index
      %c0_96 = arith.constant 0 : index
      %478 = vector.load %arg4[%477, %c0_96] : memref<128x128xf32, #tpu.memory_space<vmem>>, vector<1x128xf32>
      %479 = vector.broadcast %474 : f32 to vector<1x128xf32>
      %480 = arith.mulf %479, %478 : vector<1x128xf32>
      %481 = arith.addf %471, %480 : vector<1x128xf32>
      %c38_i32 = arith.constant 38 : i32
      %482 = arith.addi %98, %c38_i32 : i32
      %483 = arith.index_cast %482 : i32 to index
      %484 = memref.load %arg2[%483] : memref<1024xf32, #tpu.memory_space<smem>>
      %485 = arith.index_cast %482 : i32 to index
      %486 = memref.load %arg1[%485] : memref<1024xi32, #tpu.memory_space<smem>>
      %487 = arith.index_cast %486 : i32 to index
      %c0_97 = arith.constant 0 : index
      %488 = vector.load %arg4[%487, %c0_97] : memref<128x128xf32, #tpu.memory_space<vmem>>, vector<1x128xf32>
      %489 = vector.broadcast %484 : f32 to vector<1x128xf32>
      %490 = arith.mulf %489, %488 : vector<1x128xf32>
      %491 = arith.addf %481, %490 : vector<1x128xf32>
      %c39_i32 = arith.constant 39 : i32
      %492 = arith.addi %98, %c39_i32 : i32
      %493 = arith.index_cast %492 : i32 to index
      %494 = memref.load %arg2[%493] : memref<1024xf32, #tpu.memory_space<smem>>
      %495 = arith.index_cast %492 : i32 to index
      %496 = memref.load %arg1[%495] : memref<1024xi32, #tpu.memory_space<smem>>
      %497 = arith.index_cast %496 : i32 to index
      %c0_98 = arith.constant 0 : index
      %498 = vector.load %arg4[%497, %c0_98] : memref<128x128xf32, #tpu.memory_space<vmem>>, vector<1x128xf32>
      %499 = vector.broadcast %494 : f32 to vector<1x128xf32>
      %500 = arith.mulf %499, %498 : vector<1x128xf32>
      %501 = arith.addf %491, %500 : vector<1x128xf32>
      %c40_i32 = arith.constant 40 : i32
      %502 = arith.addi %98, %c40_i32 : i32
      %503 = arith.index_cast %502 : i32 to index
      %504 = memref.load %arg2[%503] : memref<1024xf32, #tpu.memory_space<smem>>
      %505 = arith.index_cast %502 : i32 to index
      %506 = memref.load %arg1[%505] : memref<1024xi32, #tpu.memory_space<smem>>
      %507 = arith.index_cast %506 : i32 to index
      %c0_99 = arith.constant 0 : index
      %508 = vector.load %arg4[%507, %c0_99] : memref<128x128xf32, #tpu.memory_space<vmem>>, vector<1x128xf32>
      %509 = vector.broadcast %504 : f32 to vector<1x128xf32>
      %510 = arith.mulf %509, %508 : vector<1x128xf32>
      %511 = arith.addf %501, %510 : vector<1x128xf32>
      %c41_i32 = arith.constant 41 : i32
      %512 = arith.addi %98, %c41_i32 : i32
      %513 = arith.index_cast %512 : i32 to index
      %514 = memref.load %arg2[%513] : memref<1024xf32, #tpu.memory_space<smem>>
      %515 = arith.index_cast %512 : i32 to index
      %516 = memref.load %arg1[%515] : memref<1024xi32, #tpu.memory_space<smem>>
      %517 = arith.index_cast %516 : i32 to index
      %c0_100 = arith.constant 0 : index
      %518 = vector.load %arg4[%517, %c0_100] : memref<128x128xf32, #tpu.memory_space<vmem>>, vector<1x128xf32>
      %519 = vector.broadcast %514 : f32 to vector<1x128xf32>
      %520 = arith.mulf %519, %518 : vector<1x128xf32>
      %521 = arith.addf %511, %520 : vector<1x128xf32>
      %c42_i32 = arith.constant 42 : i32
      %522 = arith.addi %98, %c42_i32 : i32
      %523 = arith.index_cast %522 : i32 to index
      %524 = memref.load %arg2[%523] : memref<1024xf32, #tpu.memory_space<smem>>
      %525 = arith.index_cast %522 : i32 to index
      %526 = memref.load %arg1[%525] : memref<1024xi32, #tpu.memory_space<smem>>
      %527 = arith.index_cast %526 : i32 to index
      %c0_101 = arith.constant 0 : index
      %528 = vector.load %arg4[%527, %c0_101] : memref<128x128xf32, #tpu.memory_space<vmem>>, vector<1x128xf32>
      %529 = vector.broadcast %524 : f32 to vector<1x128xf32>
      %530 = arith.mulf %529, %528 : vector<1x128xf32>
      %531 = arith.addf %521, %530 : vector<1x128xf32>
      %c43_i32 = arith.constant 43 : i32
      %532 = arith.addi %98, %c43_i32 : i32
      %533 = arith.index_cast %532 : i32 to index
      %534 = memref.load %arg2[%533] : memref<1024xf32, #tpu.memory_space<smem>>
      %535 = arith.index_cast %532 : i32 to index
      %536 = memref.load %arg1[%535] : memref<1024xi32, #tpu.memory_space<smem>>
      %537 = arith.index_cast %536 : i32 to index
      %c0_102 = arith.constant 0 : index
      %538 = vector.load %arg4[%537, %c0_102] : memref<128x128xf32, #tpu.memory_space<vmem>>, vector<1x128xf32>
      %539 = vector.broadcast %534 : f32 to vector<1x128xf32>
      %540 = arith.mulf %539, %538 : vector<1x128xf32>
      %541 = arith.addf %531, %540 : vector<1x128xf32>
      %c44_i32 = arith.constant 44 : i32
      %542 = arith.addi %98, %c44_i32 : i32
      %543 = arith.index_cast %542 : i32 to index
      %544 = memref.load %arg2[%543] : memref<1024xf32, #tpu.memory_space<smem>>
      %545 = arith.index_cast %542 : i32 to index
      %546 = memref.load %arg1[%545] : memref<1024xi32, #tpu.memory_space<smem>>
      %547 = arith.index_cast %546 : i32 to index
      %c0_103 = arith.constant 0 : index
      %548 = vector.load %arg4[%547, %c0_103] : memref<128x128xf32, #tpu.memory_space<vmem>>, vector<1x128xf32>
      %549 = vector.broadcast %544 : f32 to vector<1x128xf32>
      %550 = arith.mulf %549, %548 : vector<1x128xf32>
      %551 = arith.addf %541, %550 : vector<1x128xf32>
      %c45_i32 = arith.constant 45 : i32
      %552 = arith.addi %98, %c45_i32 : i32
      %553 = arith.index_cast %552 : i32 to index
      %554 = memref.load %arg2[%553] : memref<1024xf32, #tpu.memory_space<smem>>
      %555 = arith.index_cast %552 : i32 to index
      %556 = memref.load %arg1[%555] : memref<1024xi32, #tpu.memory_space<smem>>
      %557 = arith.index_cast %556 : i32 to index
      %c0_104 = arith.constant 0 : index
      %558 = vector.load %arg4[%557, %c0_104] : memref<128x128xf32, #tpu.memory_space<vmem>>, vector<1x128xf32>
      %559 = vector.broadcast %554 : f32 to vector<1x128xf32>
      %560 = arith.mulf %559, %558 : vector<1x128xf32>
      %561 = arith.addf %551, %560 : vector<1x128xf32>
      %c46_i32 = arith.constant 46 : i32
      %562 = arith.addi %98, %c46_i32 : i32
      %563 = arith.index_cast %562 : i32 to index
      %564 = memref.load %arg2[%563] : memref<1024xf32, #tpu.memory_space<smem>>
      %565 = arith.index_cast %562 : i32 to index
      %566 = memref.load %arg1[%565] : memref<1024xi32, #tpu.memory_space<smem>>
      %567 = arith.index_cast %566 : i32 to index
      %c0_105 = arith.constant 0 : index
      %568 = vector.load %arg4[%567, %c0_105] : memref<128x128xf32, #tpu.memory_space<vmem>>, vector<1x128xf32>
      %569 = vector.broadcast %564 : f32 to vector<1x128xf32>
      %570 = arith.mulf %569, %568 : vector<1x128xf32>
      %571 = arith.addf %561, %570 : vector<1x128xf32>
      %c47_i32 = arith.constant 47 : i32
      %572 = arith.addi %98, %c47_i32 : i32
      %573 = arith.index_cast %572 : i32 to index
      %574 = memref.load %arg2[%573] : memref<1024xf32, #tpu.memory_space<smem>>
      %575 = arith.index_cast %572 : i32 to index
      %576 = memref.load %arg1[%575] : memref<1024xi32, #tpu.memory_space<smem>>
      %577 = arith.index_cast %576 : i32 to index
      %c0_106 = arith.constant 0 : index
      %578 = vector.load %arg4[%577, %c0_106] : memref<128x128xf32, #tpu.memory_space<vmem>>, vector<1x128xf32>
      %579 = vector.broadcast %574 : f32 to vector<1x128xf32>
      %580 = arith.mulf %579, %578 : vector<1x128xf32>
      %581 = arith.addf %571, %580 : vector<1x128xf32>
      %cst_107 = arith.constant 0.000000e+00 : f32
      %582 = vector.broadcast %cst_107 : f32 to vector<1x128xf32>
      %c48_i32 = arith.constant 48 : i32
      %583 = arith.addi %98, %c48_i32 : i32
      %584 = arith.index_cast %583 : i32 to index
      %585 = memref.load %arg2[%584] : memref<1024xf32, #tpu.memory_space<smem>>
      %586 = arith.index_cast %583 : i32 to index
      %587 = memref.load %arg1[%586] : memref<1024xi32, #tpu.memory_space<smem>>
      %588 = arith.index_cast %587 : i32 to index
      %c0_108 = arith.constant 0 : index
      %589 = vector.load %arg4[%588, %c0_108] : memref<128x128xf32, #tpu.memory_space<vmem>>, vector<1x128xf32>
      %590 = vector.broadcast %585 : f32 to vector<1x128xf32>
      %591 = arith.mulf %590, %589 : vector<1x128xf32>
      %592 = arith.addf %582, %591 : vector<1x128xf32>
      %c49_i32 = arith.constant 49 : i32
      %593 = arith.addi %98, %c49_i32 : i32
      %594 = arith.index_cast %593 : i32 to index
      %595 = memref.load %arg2[%594] : memref<1024xf32, #tpu.memory_space<smem>>
      %596 = arith.index_cast %593 : i32 to index
      %597 = memref.load %arg1[%596] : memref<1024xi32, #tpu.memory_space<smem>>
      %598 = arith.index_cast %597 : i32 to index
      %c0_109 = arith.constant 0 : index
      %599 = vector.load %arg4[%598, %c0_109] : memref<128x128xf32, #tpu.memory_space<vmem>>, vector<1x128xf32>
      %600 = vector.broadcast %595 : f32 to vector<1x128xf32>
      %601 = arith.mulf %600, %599 : vector<1x128xf32>
      %602 = arith.addf %592, %601 : vector<1x128xf32>
      %c50_i32 = arith.constant 50 : i32
      %603 = arith.addi %98, %c50_i32 : i32
      %604 = arith.index_cast %603 : i32 to index
      %605 = memref.load %arg2[%604] : memref<1024xf32, #tpu.memory_space<smem>>
      %606 = arith.index_cast %603 : i32 to index
      %607 = memref.load %arg1[%606] : memref<1024xi32, #tpu.memory_space<smem>>
      %608 = arith.index_cast %607 : i32 to index
      %c0_110 = arith.constant 0 : index
      %609 = vector.load %arg4[%608, %c0_110] : memref<128x128xf32, #tpu.memory_space<vmem>>, vector<1x128xf32>
      %610 = vector.broadcast %605 : f32 to vector<1x128xf32>
      %611 = arith.mulf %610, %609 : vector<1x128xf32>
      %612 = arith.addf %602, %611 : vector<1x128xf32>
      %c51_i32 = arith.constant 51 : i32
      %613 = arith.addi %98, %c51_i32 : i32
      %614 = arith.index_cast %613 : i32 to index
      %615 = memref.load %arg2[%614] : memref<1024xf32, #tpu.memory_space<smem>>
      %616 = arith.index_cast %613 : i32 to index
      %617 = memref.load %arg1[%616] : memref<1024xi32, #tpu.memory_space<smem>>
      %618 = arith.index_cast %617 : i32 to index
      %c0_111 = arith.constant 0 : index
      %619 = vector.load %arg4[%618, %c0_111] : memref<128x128xf32, #tpu.memory_space<vmem>>, vector<1x128xf32>
      %620 = vector.broadcast %615 : f32 to vector<1x128xf32>
      %621 = arith.mulf %620, %619 : vector<1x128xf32>
      %622 = arith.addf %612, %621 : vector<1x128xf32>
      %c52_i32 = arith.constant 52 : i32
      %623 = arith.addi %98, %c52_i32 : i32
      %624 = arith.index_cast %623 : i32 to index
      %625 = memref.load %arg2[%624] : memref<1024xf32, #tpu.memory_space<smem>>
      %626 = arith.index_cast %623 : i32 to index
      %627 = memref.load %arg1[%626] : memref<1024xi32, #tpu.memory_space<smem>>
      %628 = arith.index_cast %627 : i32 to index
      %c0_112 = arith.constant 0 : index
      %629 = vector.load %arg4[%628, %c0_112] : memref<128x128xf32, #tpu.memory_space<vmem>>, vector<1x128xf32>
      %630 = vector.broadcast %625 : f32 to vector<1x128xf32>
      %631 = arith.mulf %630, %629 : vector<1x128xf32>
      %632 = arith.addf %622, %631 : vector<1x128xf32>
      %c53_i32 = arith.constant 53 : i32
      %633 = arith.addi %98, %c53_i32 : i32
      %634 = arith.index_cast %633 : i32 to index
      %635 = memref.load %arg2[%634] : memref<1024xf32, #tpu.memory_space<smem>>
      %636 = arith.index_cast %633 : i32 to index
      %637 = memref.load %arg1[%636] : memref<1024xi32, #tpu.memory_space<smem>>
      %638 = arith.index_cast %637 : i32 to index
      %c0_113 = arith.constant 0 : index
      %639 = vector.load %arg4[%638, %c0_113] : memref<128x128xf32, #tpu.memory_space<vmem>>, vector<1x128xf32>
      %640 = vector.broadcast %635 : f32 to vector<1x128xf32>
      %641 = arith.mulf %640, %639 : vector<1x128xf32>
      %642 = arith.addf %632, %641 : vector<1x128xf32>
      %c54_i32 = arith.constant 54 : i32
      %643 = arith.addi %98, %c54_i32 : i32
      %644 = arith.index_cast %643 : i32 to index
      %645 = memref.load %arg2[%644] : memref<1024xf32, #tpu.memory_space<smem>>
      %646 = arith.index_cast %643 : i32 to index
      %647 = memref.load %arg1[%646] : memref<1024xi32, #tpu.memory_space<smem>>
      %648 = arith.index_cast %647 : i32 to index
      %c0_114 = arith.constant 0 : index
      %649 = vector.load %arg4[%648, %c0_114] : memref<128x128xf32, #tpu.memory_space<vmem>>, vector<1x128xf32>
      %650 = vector.broadcast %645 : f32 to vector<1x128xf32>
      %651 = arith.mulf %650, %649 : vector<1x128xf32>
      %652 = arith.addf %642, %651 : vector<1x128xf32>
      %c55_i32 = arith.constant 55 : i32
      %653 = arith.addi %98, %c55_i32 : i32
      %654 = arith.index_cast %653 : i32 to index
      %655 = memref.load %arg2[%654] : memref<1024xf32, #tpu.memory_space<smem>>
      %656 = arith.index_cast %653 : i32 to index
      %657 = memref.load %arg1[%656] : memref<1024xi32, #tpu.memory_space<smem>>
      %658 = arith.index_cast %657 : i32 to index
      %c0_115 = arith.constant 0 : index
      %659 = vector.load %arg4[%658, %c0_115] : memref<128x128xf32, #tpu.memory_space<vmem>>, vector<1x128xf32>
      %660 = vector.broadcast %655 : f32 to vector<1x128xf32>
      %661 = arith.mulf %660, %659 : vector<1x128xf32>
      %662 = arith.addf %652, %661 : vector<1x128xf32>
      %c56_i32 = arith.constant 56 : i32
      %663 = arith.addi %98, %c56_i32 : i32
      %664 = arith.index_cast %663 : i32 to index
      %665 = memref.load %arg2[%664] : memref<1024xf32, #tpu.memory_space<smem>>
      %666 = arith.index_cast %663 : i32 to index
      %667 = memref.load %arg1[%666] : memref<1024xi32, #tpu.memory_space<smem>>
      %668 = arith.index_cast %667 : i32 to index
      %c0_116 = arith.constant 0 : index
      %669 = vector.load %arg4[%668, %c0_116] : memref<128x128xf32, #tpu.memory_space<vmem>>, vector<1x128xf32>
      %670 = vector.broadcast %665 : f32 to vector<1x128xf32>
      %671 = arith.mulf %670, %669 : vector<1x128xf32>
      %672 = arith.addf %662, %671 : vector<1x128xf32>
      %c57_i32 = arith.constant 57 : i32
      %673 = arith.addi %98, %c57_i32 : i32
      %674 = arith.index_cast %673 : i32 to index
      %675 = memref.load %arg2[%674] : memref<1024xf32, #tpu.memory_space<smem>>
      %676 = arith.index_cast %673 : i32 to index
      %677 = memref.load %arg1[%676] : memref<1024xi32, #tpu.memory_space<smem>>
      %678 = arith.index_cast %677 : i32 to index
      %c0_117 = arith.constant 0 : index
      %679 = vector.load %arg4[%678, %c0_117] : memref<128x128xf32, #tpu.memory_space<vmem>>, vector<1x128xf32>
      %680 = vector.broadcast %675 : f32 to vector<1x128xf32>
      %681 = arith.mulf %680, %679 : vector<1x128xf32>
      %682 = arith.addf %672, %681 : vector<1x128xf32>
      %c58_i32 = arith.constant 58 : i32
      %683 = arith.addi %98, %c58_i32 : i32
      %684 = arith.index_cast %683 : i32 to index
      %685 = memref.load %arg2[%684] : memref<1024xf32, #tpu.memory_space<smem>>
      %686 = arith.index_cast %683 : i32 to index
      %687 = memref.load %arg1[%686] : memref<1024xi32, #tpu.memory_space<smem>>
      %688 = arith.index_cast %687 : i32 to index
      %c0_118 = arith.constant 0 : index
      %689 = vector.load %arg4[%688, %c0_118] : memref<128x128xf32, #tpu.memory_space<vmem>>, vector<1x128xf32>
      %690 = vector.broadcast %685 : f32 to vector<1x128xf32>
      %691 = arith.mulf %690, %689 : vector<1x128xf32>
      %692 = arith.addf %682, %691 : vector<1x128xf32>
      %c59_i32 = arith.constant 59 : i32
      %693 = arith.addi %98, %c59_i32 : i32
      %694 = arith.index_cast %693 : i32 to index
      %695 = memref.load %arg2[%694] : memref<1024xf32, #tpu.memory_space<smem>>
      %696 = arith.index_cast %693 : i32 to index
      %697 = memref.load %arg1[%696] : memref<1024xi32, #tpu.memory_space<smem>>
      %698 = arith.index_cast %697 : i32 to index
      %c0_119 = arith.constant 0 : index
      %699 = vector.load %arg4[%698, %c0_119] : memref<128x128xf32, #tpu.memory_space<vmem>>, vector<1x128xf32>
      %700 = vector.broadcast %695 : f32 to vector<1x128xf32>
      %701 = arith.mulf %700, %699 : vector<1x128xf32>
      %702 = arith.addf %692, %701 : vector<1x128xf32>
      %c60_i32 = arith.constant 60 : i32
      %703 = arith.addi %98, %c60_i32 : i32
      %704 = arith.index_cast %703 : i32 to index
      %705 = memref.load %arg2[%704] : memref<1024xf32, #tpu.memory_space<smem>>
      %706 = arith.index_cast %703 : i32 to index
      %707 = memref.load %arg1[%706] : memref<1024xi32, #tpu.memory_space<smem>>
      %708 = arith.index_cast %707 : i32 to index
      %c0_120 = arith.constant 0 : index
      %709 = vector.load %arg4[%708, %c0_120] : memref<128x128xf32, #tpu.memory_space<vmem>>, vector<1x128xf32>
      %710 = vector.broadcast %705 : f32 to vector<1x128xf32>
      %711 = arith.mulf %710, %709 : vector<1x128xf32>
      %712 = arith.addf %702, %711 : vector<1x128xf32>
      %c61_i32 = arith.constant 61 : i32
      %713 = arith.addi %98, %c61_i32 : i32
      %714 = arith.index_cast %713 : i32 to index
      %715 = memref.load %arg2[%714] : memref<1024xf32, #tpu.memory_space<smem>>
      %716 = arith.index_cast %713 : i32 to index
      %717 = memref.load %arg1[%716] : memref<1024xi32, #tpu.memory_space<smem>>
      %718 = arith.index_cast %717 : i32 to index
      %c0_121 = arith.constant 0 : index
      %719 = vector.load %arg4[%718, %c0_121] : memref<128x128xf32, #tpu.memory_space<vmem>>, vector<1x128xf32>
      %720 = vector.broadcast %715 : f32 to vector<1x128xf32>
      %721 = arith.mulf %720, %719 : vector<1x128xf32>
      %722 = arith.addf %712, %721 : vector<1x128xf32>
      %c62_i32 = arith.constant 62 : i32
      %723 = arith.addi %98, %c62_i32 : i32
      %724 = arith.index_cast %723 : i32 to index
      %725 = memref.load %arg2[%724] : memref<1024xf32, #tpu.memory_space<smem>>
      %726 = arith.index_cast %723 : i32 to index
      %727 = memref.load %arg1[%726] : memref<1024xi32, #tpu.memory_space<smem>>
      %728 = arith.index_cast %727 : i32 to index
      %c0_122 = arith.constant 0 : index
      %729 = vector.load %arg4[%728, %c0_122] : memref<128x128xf32, #tpu.memory_space<vmem>>, vector<1x128xf32>
      %730 = vector.broadcast %725 : f32 to vector<1x128xf32>
      %731 = arith.mulf %730, %729 : vector<1x128xf32>
      %732 = arith.addf %722, %731 : vector<1x128xf32>
      %c63_i32 = arith.constant 63 : i32
      %733 = arith.addi %98, %c63_i32 : i32
      %734 = arith.index_cast %733 : i32 to index
      %735 = memref.load %arg2[%734] : memref<1024xf32, #tpu.memory_space<smem>>
      %736 = arith.index_cast %733 : i32 to index
      %737 = memref.load %arg1[%736] : memref<1024xi32, #tpu.memory_space<smem>>
      %738 = arith.index_cast %737 : i32 to index
      %c0_123 = arith.constant 0 : index
      %739 = vector.load %arg4[%738, %c0_123] : memref<128x128xf32, #tpu.memory_space<vmem>>, vector<1x128xf32>
      %740 = vector.broadcast %735 : f32 to vector<1x128xf32>
      %741 = arith.mulf %740, %739 : vector<1x128xf32>
      %742 = arith.addf %732, %741 : vector<1x128xf32>
      %743 = tpu.concatenate %259, %420, %581, %742 in 1 : vector<1x128xf32>, vector<1x128xf32>, vector<1x128xf32>, vector<1x128xf32> -> vector<1x512xf32>
      %744 = arith.index_cast %96 : i32 to index
      %c0_124 = arith.constant 0 : index
      %745 = vector.load %arg18[%744, %c0_124] : memref<16x512xf32, #tpu.memory_space<vmem>>, vector<1x512xf32>
      tpu.vector_store %arg18[%744, %c0_124], %743 {strides = array<i32>} : memref<16x512xf32, #tpu.memory_space<vmem>>, vector<1x512xf32>,
    }
    %c16_i32_1 = arith.constant 16 : i32
    %c0 = arith.constant 0 : index
    %c0_2 = arith.constant 0 : index
    %2 = vector.load %arg3[%c0, %c0_2] : memref<16x4xf32, #tpu.memory_space<vmem>>, vector<16x4xf32>
    %c0_3 = arith.constant 0 : index
    %c0_4 = arith.constant 0 : index
    %3 = vector.load %arg5[%c0_3, %c0_4] : memref<4x128xf32, #tpu.memory_space<vmem>>, vector<4x128xf32>
    %cst = arith.constant dense<0.000000e+00> : vector<16x128xf32>
    %4 = tpu.matmul %2, %3, %cst {dimension_numbers = #tpu.dot_dimension_numbers<[1], [0], [0], [1], [0, 0, 1, 1], [], []>} : vector<16x4xf32>, vector<4x128xf32>, vector<16x128xf32> -> vector<16x128xf32>
    %c0_5 = arith.constant 0 : index
    %c0_6 = arith.constant 0 : index
    %5 = vector.load %arg6[%c0_5, %c0_6] : memref<1x128xf32, #tpu.memory_space<vmem>>, vector<1x128xf32>
    %6 = vector.broadcast %5 : vector<1x128xf32> to vector<16x128xf32>
    %7 = arith.addf %4, %6 : vector<16x128xf32>
    %c0_7 = arith.constant 0 : index
    %c0_8 = arith.constant 0 : index
    %8 = vector.load %arg7[%c0_7, %c0_8] : memref<1x128xf32, #tpu.memory_space<vmem>>, vector<1x128xf32>
    %c0_9 = arith.constant 0 : index
    %c0_10 = arith.constant 0 : index
    %9 = vector.load %arg8[%c0_9, %c0_10] : memref<1x128xf32, #tpu.memory_space<vmem>>, vector<1x128xf32>
    %cst_11 = arith.constant dense<0.000000e+00> : vector<16xf32>
    %10 = vector.multi_reduction <add>, %7, %cst_11 [1] : vector<16x128xf32> to vector<16xf32>
    %11 = vector.shape_cast %10 : vector<16xf32> to vector<16x1xf32>
    %cst_12 = arith.constant 1.280000e+02 : f32
    %12 = vector.broadcast %cst_12 : f32 to vector<16x1xf32>
    %13 = arith.divf %11, %12 : vector<16x1xf32>
    %14 = vector.broadcast %13 : vector<16x1xf32> to vector<16x128xf32>
    %15 = arith.subf %7, %14 : vector<16x128xf32>
    %16 = arith.mulf %15, %15 : vector<16x128xf32>
    %cst_13 = arith.constant dense<0.000000e+00> : vector<16xf32>
    %17 = vector.multi_reduction <add>, %16, %cst_13 [1] : vector<16x128xf32> to vector<16xf32>
    %18 = vector.shape_cast %17 : vector<16xf32> to vector<16x1xf32>
    %cst_14 = arith.constant 1.280000e+02 : f32
    %19 = vector.broadcast %cst_14 : f32 to vector<16x1xf32>
    %20 = arith.divf %18, %19 : vector<16x1xf32>
    %cst_15 = arith.constant 9.99999974E-6 : f32
    %21 = vector.broadcast %cst_15 : f32 to vector<16x1xf32>
    %22 = arith.addf %20, %21 : vector<16x1xf32>
    %23 = math.rsqrt %22 : vector<16x1xf32>
    %24 = vector.broadcast %23 : vector<16x1xf32> to vector<16x128xf32>
    %25 = arith.mulf %15, %24 : vector<16x128xf32>
    %26 = vector.broadcast %8 : vector<1x128xf32> to vector<16x128xf32>
    %27 = arith.mulf %25, %26 : vector<16x128xf32>
    %28 = vector.broadcast %9 : vector<1x128xf32> to vector<16x128xf32>
    %29 = arith.addf %27, %28 : vector<16x128xf32>
    %cst_16 = arith.constant 0.000000e+00 : f32
    %30 = vector.broadcast %cst_16 : f32 to vector<16x128xf32>
    %31 = arith.maximumf %29, %30 : vector<16x128xf32>
    %c0_17 = arith.constant 0 : index
    %c0_18 = arith.constant 0 : index
    %32 = vector.load %arg18[%c0_17, %c0_18] : memref<16x512xf32, #tpu.memory_space<vmem>>, vector<16x512xf32>
    %33 = arith.truncf %32 : vector<16x512xf32> to vector<16x512xbf16>
    %c0_19 = arith.constant 0 : index
    %c0_20 = arith.constant 0 : index
    %34 = vector.load %arg9[%c0_19, %c0_20] : memref<512x128xbf16, #tpu.memory_space<vmem>>, vector<512x128xbf16>
    %cst_21 = arith.constant dense<0.000000e+00> : vector<16x128xf32>
    %35 = tpu.matmul %33, %34, %cst_21 {dimension_numbers = #tpu.dot_dimension_numbers<[1], [0], [0], [1], [0, 0, 1, 1], [], []>} : vector<16x512xbf16>, vector<512x128xbf16>, vector<16x128xf32> -> vector<16x128xf32>
    %c0_22 = arith.constant 0 : index
    %c0_23 = arith.constant 0 : index
    %36 = vector.load %arg10[%c0_22, %c0_23] : memref<1x128xf32, #tpu.memory_space<vmem>>, vector<1x128xf32>
    %37 = vector.broadcast %36 : vector<1x128xf32> to vector<16x128xf32>
    %38 = arith.addf %35, %37 : vector<16x128xf32>
    %c0_24 = arith.constant 0 : index
    %c0_25 = arith.constant 0 : index
    %39 = vector.load %arg11[%c0_24, %c0_25] : memref<1x128xf32, #tpu.memory_space<vmem>>, vector<1x128xf32>
    %c0_26 = arith.constant 0 : index
    %c0_27 = arith.constant 0 : index
    %40 = vector.load %arg12[%c0_26, %c0_27] : memref<1x128xf32, #tpu.memory_space<vmem>>, vector<1x128xf32>
    %cst_28 = arith.constant dense<0.000000e+00> : vector<16xf32>
    %41 = vector.multi_reduction <add>, %38, %cst_28 [1] : vector<16x128xf32> to vector<16xf32>
    %42 = vector.shape_cast %41 : vector<16xf32> to vector<16x1xf32>
    %cst_29 = arith.constant 1.280000e+02 : f32
    %43 = vector.broadcast %cst_29 : f32 to vector<16x1xf32>
    %44 = arith.divf %42, %43 : vector<16x1xf32>
    %45 = vector.broadcast %44 : vector<16x1xf32> to vector<16x128xf32>
    %46 = arith.subf %38, %45 : vector<16x128xf32>
    %47 = arith.mulf %46, %46 : vector<16x128xf32>
    %cst_30 = arith.constant dense<0.000000e+00> : vector<16xf32>
    %48 = vector.multi_reduction <add>, %47, %cst_30 [1] : vector<16x128xf32> to vector<16xf32>
    %49 = vector.shape_cast %48 : vector<16xf32> to vector<16x1xf32>
    %cst_31 = arith.constant 1.280000e+02 : f32
    %50 = vector.broadcast %cst_31 : f32 to vector<16x1xf32>
    %51 = arith.divf %49, %50 : vector<16x1xf32>
    %cst_32 = arith.constant 9.99999974E-6 : f32
    %52 = vector.broadcast %cst_32 : f32 to vector<16x1xf32>
    %53 = arith.addf %51, %52 : vector<16x1xf32>
    %54 = math.rsqrt %53 : vector<16x1xf32>
    %55 = vector.broadcast %54 : vector<16x1xf32> to vector<16x128xf32>
    %56 = arith.mulf %46, %55 : vector<16x128xf32>
    %57 = vector.broadcast %39 : vector<1x128xf32> to vector<16x128xf32>
    %58 = arith.mulf %56, %57 : vector<16x128xf32>
    %59 = vector.broadcast %40 : vector<1x128xf32> to vector<16x128xf32>
    %60 = arith.addf %58, %59 : vector<16x128xf32>
    %cst_33 = arith.constant 0.000000e+00 : f32
    %61 = vector.broadcast %cst_33 : f32 to vector<16x128xf32>
    %62 = arith.maximumf %60, %61 : vector<16x128xf32>
    %63 = tpu.concatenate %31, %62 in 1 : vector<16x128xf32>, vector<16x128xf32> -> vector<16x256xf32>
    %64 = arith.truncf %63 : vector<16x256xf32> to vector<16x256xbf16>
    %c0_34 = arith.constant 0 : index
    %c0_35 = arith.constant 0 : index
    %65 = vector.load %arg13[%c0_34, %c0_35] : memref<256x128xbf16, #tpu.memory_space<vmem>>, vector<256x128xbf16>
    %cst_36 = arith.constant dense<0.000000e+00> : vector<16x128xf32>
    %66 = tpu.matmul %64, %65, %cst_36 {dimension_numbers = #tpu.dot_dimension_numbers<[1], [0], [0], [1], [0, 0, 1, 1], [], []>} : vector<16x256xbf16>, vector<256x128xbf16>, vector<16x128xf32> -> vector<16x128xf32>
    %c0_37 = arith.constant 0 : index
    %c0_38 = arith.constant 0 : index
    %67 = vector.load %arg14[%c0_37, %c0_38] : memref<1x128xf32, #tpu.memory_space<vmem>>, vector<1x128xf32>
    %68 = vector.broadcast %67 : vector<1x128xf32> to vector<16x128xf32>
    %69 = arith.addf %66, %68 : vector<16x128xf32>
    %c0_39 = arith.constant 0 : index
    %c0_40 = arith.constant 0 : index
    %70 = vector.load %arg15[%c0_39, %c0_40] : memref<1x128xf32, #tpu.memory_space<vmem>>, vector<1x128xf32>
    %c0_41 = arith.constant 0 : index
    %c0_42 = arith.constant 0 : index
    %71 = vector.load %arg16[%c0_41, %c0_42] : memref<1x128xf32, #tpu.memory_space<vmem>>, vector<1x128xf32>
    %cst_43 = arith.constant dense<0.000000e+00> : vector<16xf32>
    %72 = vector.multi_reduction <add>, %69, %cst_43 [1] : vector<16x128xf32> to vector<16xf32>
    %73 = vector.shape_cast %72 : vector<16xf32> to vector<16x1xf32>
    %cst_44 = arith.constant 1.280000e+02 : f32
    %74 = vector.broadcast %cst_44 : f32 to vector<16x1xf32>
    %75 = arith.divf %73, %74 : vector<16x1xf32>
    %76 = vector.broadcast %75 : vector<16x1xf32> to vector<16x128xf32>
    %77 = arith.subf %69, %76 : vector<16x128xf32>
    %78 = arith.mulf %77, %77 : vector<16x128xf32>
    %cst_45 = arith.constant dense<0.000000e+00> : vector<16xf32>
    %79 = vector.multi_reduction <add>, %78, %cst_45 [1] : vector<16x128xf32> to vector<16xf32>
    %80 = vector.shape_cast %79 : vector<16xf32> to vector<16x1xf32>
    %cst_46 = arith.constant 1.280000e+02 : f32
    %81 = vector.broadcast %cst_46 : f32 to vector<16x1xf32>
    %82 = arith.divf %80, %81 : vector<16x1xf32>
    %cst_47 = arith.constant 9.99999974E-6 : f32
    %83 = vector.broadcast %cst_47 : f32 to vector<16x1xf32>
    %84 = arith.addf %82, %83 : vector<16x1xf32>
    %85 = math.rsqrt %84 : vector<16x1xf32>
    %86 = vector.broadcast %85 : vector<16x1xf32> to vector<16x128xf32>
    %87 = arith.mulf %77, %86 : vector<16x128xf32>
    %88 = vector.broadcast %70 : vector<1x128xf32> to vector<16x128xf32>
    %89 = arith.mulf %87, %88 : vector<16x128xf32>
    %90 = vector.broadcast %71 : vector<1x128xf32> to vector<16x128xf32>
    %91 = arith.addf %89, %90 : vector<16x128xf32>
    %cst_48 = arith.constant 0.000000e+00 : f32
    %92 = vector.broadcast %cst_48 : f32 to vector<16x128xf32>
    %93 = arith.maximumf %91, %92 : vector<16x128xf32>
    %c0_49 = arith.constant 0 : index
    %c0_50 = arith.constant 0 : index
    %94 = vector.load %arg17[%c0_49, %c0_50] : memref<16x128xf32, #tpu.memory_space<vmem>>, vector<16x128xf32>
    tpu.vector_store %arg17[%c0_49, %c0_50], %93 {strides = array<i32>} : memref<16x128xf32, #tpu.memory_space<vmem>>, vector<16x128xf32>,
    return
  }
  func.func @transform_0(%arg0: i32) -> i32 {
    %c0_i32 = arith.constant 0 : i32
    %c0_i32_0 = arith.constant 0 : i32
    return %c0_i32 : i32
  }
  func.func @transform_1(%arg0: i32) -> i32 {
    %c0_i32 = arith.constant 0 : i32
    %c0_i32_0 = arith.constant 0 : i32
    return %c0_i32 : i32
  }
  func.func @transform_2(%arg0: i32) -> (i32, i32) {
    %c0_i32 = arith.constant 0 : i32
    %c0_i32_0 = arith.constant 0 : i32
    return %arg0, %c0_i32 : i32, i32
  }
  func.func @transform_3(%arg0: i32) -> (i32, i32) {
    %c0_i32 = arith.constant 0 : i32
    %c0_i32_0 = arith.constant 0 : i32
    %c0_i32_1 = arith.constant 0 : i32
    return %c0_i32, %c0_i32_0 : i32, i32
  }
  func.func @transform_4(%arg0: i32) -> (i32, i32) {
    %c0_i32 = arith.constant 0 : i32
    %c0_i32_0 = arith.constant 0 : i32
    %c0_i32_1 = arith.constant 0 : i32
    return %c0_i32, %c0_i32_0 : i32, i32
  }
  func.func @transform_5(%arg0: i32) -> (i32, i32) {
    %c0_i32 = arith.constant 0 : i32
    %c0_i32_0 = arith.constant 0 : i32
    %c0_i32_1 = arith.constant 0 : i32
    return %c0_i32, %c0_i32_0 : i32, i32
  }
  func.func @transform_6(%arg0: i32) -> (i32, i32) {
    %c0_i32 = arith.constant 0 : i32
    %c0_i32_0 = arith.constant 0 : i32
    %c0_i32_1 = arith.constant 0 : i32
    return %c0_i32, %c0_i32_0 : i32, i32
  }
  func.func @transform_7(%arg0: i32) -> (i32, i32) {
    %c0_i32 = arith.constant 0 : i32
    %c0_i32_0 = arith.constant 0 : i32
    %c0_i32_1 = arith.constant 0 : i32
    return %c0_i32, %c0_i32_0 : i32, i32
  }
  func.func @transform_8(%arg0: i32) -> (i32, i32) {
    %c0_i32 = arith.constant 0 : i32
    %c0_i32_0 = arith.constant 0 : i32
    %c0_i32_1 = arith.constant 0 : i32
    return %c0_i32, %c0_i32_0 : i32, i32
  }
  func.func @transform_9(%arg0: i32) -> (i32, i32) {
    %c0_i32 = arith.constant 0 : i32
    %c0_i32_0 = arith.constant 0 : i32
    %c0_i32_1 = arith.constant 0 : i32
    return %c0_i32, %c0_i32_0 : i32, i32
  }
  func.func @transform_10(%arg0: i32) -> (i32, i32) {
    %c0_i32 = arith.constant 0 : i32
    %c0_i32_0 = arith.constant 0 : i32
    %c0_i32_1 = arith.constant 0 : i32
    return %c0_i32, %c0_i32_0 : i32, i32
  }
  func.func @transform_11(%arg0: i32) -> (i32, i32) {
    %c0_i32 = arith.constant 0 : i32
    %c0_i32_0 = arith.constant 0 : i32
    %c0_i32_1 = arith.constant 0 : i32
    return %c0_i32, %c0_i32_0 : i32, i32
  }
  func.func @transform_12(%arg0: i32) -> (i32, i32) {
    %c0_i32 = arith.constant 0 : i32
    %c0_i32_0 = arith.constant 0 : i32
    %c0_i32_1 = arith.constant 0 : i32
    return %c0_i32, %c0_i32_0 : i32, i32
  }
  func.func @transform_13(%arg0: i32) -> (i32, i32) {
    %c0_i32 = arith.constant 0 : i32
    %c0_i32_0 = arith.constant 0 : i32
    %c0_i32_1 = arith.constant 0 : i32
    return %c0_i32, %c0_i32_0 : i32, i32
  }
  func.func @transform_14(%arg0: i32) -> (i32, i32) {
    %c0_i32 = arith.constant 0 : i32
    %c0_i32_0 = arith.constant 0 : i32
    %c0_i32_1 = arith.constant 0 : i32
    return %c0_i32, %c0_i32_0 : i32, i32
  }
  func.func @transform_15(%arg0: i32) -> (i32, i32) {
    %c0_i32 = arith.constant 0 : i32
    %c0_i32_0 = arith.constant 0 : i32
    %c0_i32_1 = arith.constant 0 : i32
    return %c0_i32, %c0_i32_0 : i32, i32
  }
  func.func @transform_16(%arg0: i32) -> (i32, i32) {
    %c0_i32 = arith.constant 0 : i32
    %c0_i32_0 = arith.constant 0 : i32
    return %arg0, %c0_i32 : i32, i32
  }
}

</mosaic_0001>

<bundles_post_ra>
// kernel: tpu_custom_call.1
= control target key start
LH: loop header
LB: loop body
LE: loop exit
PB: predicated region body
PF: predicated region fallthrough
CT: control target
= control target key end

     0   :  { %s2647_s0 = inlined_call_operand.vmem [shape: s32[1024], index: 0, kind: input, shape index: {}]   ;;  %s2648_s1 = inlined_call_operand.vmem [shape: f32[1024], index: 1, kind: input, shape index: {}]   ;;  %s2649_s2 = inlined_call_operand.vmem [shape: f32[16,4], index: 2, kind: input, shape index: {}]   ;;  %s2650_s3 = inlined_call_operand.hbm [shape: f32[128,128], index: 3, kind: input, shape index: {}]   ;;  %s2651_s4 = inlined_call_operand.vmem [shape: f32[4,128], index: 4, kind: input, shape index: {}]   ;;  %s2652_s5 = inlined_call_operand.vmem [shape: f32[1,128], index: 5, kind: input, shape index: {}]   ;;  %s2653_s6 = inlined_call_operand.vmem [shape: f32[1,128], index: 6, kind: input, shape index: {}]   ;;  %s2654_s7 = inlined_call_operand.vmem [shape: f32[1,128], index: 7, kind: input, shape index: {}]   ;;  %s2655_s8 = inlined_call_operand.hbm [shape: bf16[512,128], index: 8, kind: input, shape index: {}]   ;;  %s2656_s9 = inlined_call_operand.vmem [shape: f32[1,128], index: 9, kind: input, shape index: {}]   ;;  %s2657_s10 = inlined_call_operand.vmem [shape: f32[1,128], index: 10, kind: input, shape index: {}]   ;;  %s2658_s11 = inlined_call_operand.vmem [shape: f32[1,128], index: 11, kind: input, shape index: {}]   ;;  %s2659_s12 = inlined_call_operand.hbm [shape: bf16[256,128], index: 12, kind: input, shape index: {}]   ;;  %s2660_s13 = inlined_call_operand.vmem [shape: f32[1,128], index: 13, kind: input, shape index: {}]   ;;  %s2661_s14 = inlined_call_operand.vmem [shape: f32[1,128], index: 14, kind: input, shape index: {}]   ;;  %s2662_s15 = inlined_call_operand.vmem [shape: f32[1,128], index: 15, kind: input, shape index: {}]   ;;  %s2663_s16 = inlined_call_operand.hbm [shape: f32[16,128], index: 16, kind: output, shape index: {}]  }
   0x1   :  { %2673 = sst [smem:[#allocation67_spill]] %s2647_s0 }
   0x2   :  { %2674 = sst [smem:[#allocation68_spill]] %s2649_s2 }
   0x3   :  { %2675 = sst [smem:[#allocation69_spill]] %s2651_s4 }
   0x4   :  { %2676 = sst [smem:[#allocation70_spill]] %s2652_s5 }
   0x5   :  { %2677 = sst [smem:[#allocation71_spill]] %s2653_s6 }
   0x6   :  { %2678 = sst [smem:[#allocation72_spill]] %s2654_s7 }
   0x7   :  { %2679 = sst [smem:[#allocation73_spill]] %s2656_s9 }
   0x8   :  { %2680 = sst [smem:[#allocation74_spill]] %s2657_s10 }
   0x9   :  { %2681 = sst [smem:[#allocation75_spill]] %s2658_s11 }
   0xa   :  { %2682 = sst [smem:[#allocation76_spill]] %s2660_s13 }
   0xb   :  { %2683 = sst [smem:[#allocation77_spill]] %s2661_s14 }
   0xc   :  { %2684 = sst [smem:[#allocation78_spill]] %s2662_s15 }
   0xd   :  { %2685 = sst [smem:[#allocation79_spill]] %s2663_s16 }
   0xe   :  { %21 = vsyncpa [#allocation6], 0 }
   0xf   :  { %22 = vsyncpa [#allocation8], 0 }
  0x10   :  { %23 = vsyncpa [#allocation4], 0 }
  0x11   :  { %24 = vsyncpa [#allocation11], 0  ;;  %s71_s23 = sshll.u32 %s2655_s8, 4  ;;  %s72_s23 = int_to_ptr.hbm [resolvable:$true] %s71_s23 }
  0x12   :  { %25 = vsyncpa [#allocation5], 0  ;;  %s1897_s24 = smov [#allocation10]   ;;  %s2686_s28 = sld [smem:[#allocation67_spill]] }
  0x13   :  { %s73_s25 = sshll.u32 %s1897_s24, 4  ;;  %s1898_s30 = smov 64   ;;  %s74_s25 = int_to_ptr.vmem [resolvable:$true] %s73_s25 }
  0x14   :  { %s1899_s0 = smov 4   ;;  %s1900_s17 = smov [#allocation3]  }
  0x15   :  { %79 = dma.hbm_to_vmem [thread:$0]  %s72_s23, 4096, %s74_s25, [#allocation11], %s1898_s30, %s1898_s30, %s1899_s0  }
  0x16   :  { %s40_s20 = sshll.u32 %s2648_s1, 4  ;;  %s50_s22 = sshll.u32 %s2650_s3, 4  ;;  %s41_s20 = int_to_ptr.vmem [resolvable:$true] %s40_s20  ;;  %s51_s22 = int_to_ptr.hbm [resolvable:$true] %s50_s22 }
  0x17   :  { %s1901_s24 = smov [#allocation7]   ;;  %s1902_s26 = smov [#allocation9]  }
  0x18   :  { %s31_s29 = sshll.u32 %s2686_s28, 4  ;;  %s52_s27 = sshll.u32 %s1902_s26, 4  ;;  %s32_s29 = int_to_ptr.vmem [resolvable:$true] %s31_s29  ;;  %s53_s27 = int_to_ptr.vmem [resolvable:$true] %s52_s27 }
  0x19   :  { %34 = dma.vmem_to_smem %s32_s29, 128, %s1900_s17, [#allocation6]  }
  0x1a   :  { %43 = dma.vmem_to_smem %s41_s20, 128, %s1901_s24, [#allocation8]  }
  0x1b   :  { %s2664_s28 = smov 128   ;;  %s2665_s23 = smov 8  }
  0x1c   :  { %58 = dma.hbm_to_vmem [thread:$0]  %s51_s22, 2048, %s53_s27, [#allocation4], %s2664_s28, %s2664_s28, %s2665_s23  }
  0x1d   :  { %s90_s1 = sshll.u32 %s2659_s12, 4  ;;  %s1905_s17 = smov [#allocation12]   ;;  %s91_s1 = int_to_ptr.hbm [resolvable:$true] %s90_s1 }
  0x1e   :  { %s92_s18 = sshll.u32 %s1905_s17, 4  ;;  %s93_s18 = int_to_ptr.vmem [resolvable:$true] %s92_s18 }
  0x1f   :  { %98 = dma.hbm_to_vmem [thread:$0]  %s91_s1, 2048, %s93_s18, [#allocation11], %s1898_s30, %s1898_s30, %s1899_s0  }
  0x20   :  { %1883 = dma.done.wait [#allocation6], 128  }
  0x21   :  { %1884 = vsyncadd [#allocation6], 4294967168 }
  0x22   :  { %1885 = dma.done.wait [#allocation8], 128  }
  0x23   :  { %1886 = vsyncadd [#allocation8], 4294967168 }
  0x24   :  { %1887 = dma.done.wait [#allocation4], 2048  }
  0x25   :  { %1888 = vsyncadd [#allocation4], 4294965248 }
  0x26   :  { %1889 = dma.done.wait [#allocation11], 6144  }
  0x27   :  { %1890 = vsyncadd [#allocation11], 4294961152 }
  0x28   :  { %125 = sfence }
  0x29   :  { %s2011_s3 = smov 0  }
  0x2a LB: > { %2687 = sst [smem:[#allocation19_spill]] %s1895_s3  ;;  %s2017_s12 = sshll.u32 %s1895_s3, 6  ;;  %vm653_vm0 = vcmask 1040384   ;;  %vm655_vm1 = vcmask 1042434   ;;  %vm657_vm2 = vcmask 1041408   ;;  %s1895_s3 = sphi %s2011_s3, %s132_s3  }
  0x2b   : > { %s2020_s30 = sld [smem:[#allocation7 + %s2017_s12]]  ;;  %s142_s0 = sadd.s32 1, %s2017_s12 }
  0x2c   : > { %s2024_s19 = sld [smem:[#allocation3 + %s2017_s12]]  ;;  %s150_s20 = sadd.s32 2, %s2017_s12 }
  0x2d   : > { %s2027_s8 = sld [smem:[#allocation7 + %s142_s0]]  ;;  %s158_s22 = sadd.s32 3, %s2017_s12 }
  0x2e   : > { %s2029_s21 = sld [smem:[#allocation3 + %s142_s0]]  ;;  %s166_s27 = sadd.s32 4, %s2017_s12 }
  0x2f   : > { %s2032_s24 = sld [smem:[#allocation7 + %s150_s20]]  ;;  %s174_s1 = sadd.s32 5, %s2017_s12 }
  0x30   : > { %s2034_s26 = sld [smem:[#allocation3 + %s150_s20]]  ;;  %s182_s18 = sadd.s32 6, %s2017_s12 }
  0x31   : > { %s2037_s25 = sld [smem:[#allocation7 + %s158_s22]]  ;;  %s190_s0 = sadd.s32 7, %s2017_s12  ;;  %v139_v4 = vstv %s2020_s30 }
  0x32   : > { %s2039_s29 = sld [smem:[#allocation3 + %s158_s22]]  ;;  %s198_s20 = sadd.s32 8, %s2017_s12 }
  0x33   : > { %s2042_s17 = sld [smem:[#allocation7 + %s166_s27]]  ;;  %s206_s22 = sadd.s32 9, %s2017_s12  ;;  %v147_v7 = vstv %s2027_s8 }
  0x34   : > { %s2045_s28 = sld [smem:[#allocation3 + %s166_s27]]  ;;  %s214_s27 = sadd.s32 10, %s2017_s12 }
  0x35   : > { %s2048_s23 = sld [smem:[#allocation7 + %s174_s1]]  ;;  %v155_v19 = vstv %s2032_s24 }
  0x36   : > { %s2050_s16 = sld [smem:[#allocation3 + %s174_s1]]  ;;  %s222_s1 = sadd.s32 11, %s2017_s12 }
  0x37   : > { %s2053_s15 = sld [smem:[#allocation7 + %s182_s18]]  ;;  %v163_v33 = vstv %s2037_s25 }
  0x38   : > { %s2055_s14 = sld [smem:[#allocation3 + %s182_s18]]  ;;  %s230_s18 = sadd.s32 12, %s2017_s12 }
  0x39   : > { %2688 = sst [smem:[#allocation20_spill]] %s2042_s17 }
  0x3a   : > { %2689 = sst [smem:[#allocation21_spill]] %s2045_s28  ;;  %s342_s28 = sadd.s32 26, %s2017_s12 }
  0x3b   : > { %2690 = sst [smem:[#allocation22_spill]] %s2048_s23 }
  0x3c   : > { %2691 = sst [smem:[#allocation23_spill]] %s2050_s16  ;;  %s334_s16 = sadd.s32 25, %s2017_s12 }
  0x3d   : > { %2692 = sst [smem:[#allocation24_spill]] %s2053_s15 }
  0x3e   : > { %2693 = sst [smem:[#allocation25_spill]] %s2055_s14  ;;  %s326_s14 = sadd.s32 24, %s2017_s12 }
  0x3f   : > { %s2058_s13 = sld [smem:[#allocation7 + %s190_s0]] }
  0x40   : > { %s2060_s11 = sld [smem:[#allocation3 + %s190_s0]]  ;;  %s238_s0 = sadd.s32 13, %s2017_s12 }
  0x41   : > { %s2063_s10 = sld [smem:[#allocation7 + %s198_s20]] }
  0x42   : > { %s2065_s7 = sld [smem:[#allocation3 + %s198_s20]]  ;;  %s246_s20 = sadd.s32 14, %s2017_s12 }
  0x43   : > { %s2068_s6 = sld [smem:[#allocation7 + %s206_s22]] }
  0x44   : > { %s2070_s9 = sld [smem:[#allocation3 + %s206_s22]]  ;;  %s254_s22 = sadd.s32 15, %s2017_s12 }
  0x45   : > { %2694 = sst [smem:[#allocation26_spill]] %s2058_s13 }
  0x46   : > { %2695 = sst [smem:[#allocation27_spill]] %s2060_s11  ;;  %s318_s11 = sadd.s32 23, %s2017_s12 }
  0x47   : > { %2696 = sst [smem:[#allocation28_spill]] %s2063_s10 }
  0x48   : > { %2697 = sst [smem:[#allocation29_spill]] %s2065_s7 }
  0x49   : > { %2698 = sst [smem:[#allocation30_spill]] %s2068_s6 }
  0x4a   : > { %2699 = sst [smem:[#allocation31_spill]] %s2070_s9 }
  0x4b   : > { %s2073_s5 = sld [smem:[#allocation7 + %s214_s27]] }
  0x4c   : > { %s2075_s2 = sld [smem:[#allocation3 + %s214_s27]]  ;;  %s262_s27 = sadd.s32 16, %s2017_s12 }
  0x4d   : > { %s2078_s4 = sld [smem:[#allocation7 + %s222_s1]] }
  0x4e   : > { %s2080_s3 = sld [smem:[#allocation3 + %s222_s1]]  ;;  %s270_s1 = sadd.s32 17, %s2017_s12 }
  0x4f   : > { %s2083_s10 = sld [smem:[#allocation7 + %s230_s18]] }
  0x50   : > { %s2085_s7 = sld [smem:[#allocation3 + %s230_s18]]  ;;  %s278_s18 = sadd.s32 18, %s2017_s12 }
  0x51   : > { %2700 = sst [smem:[#allocation32_spill]] %s2073_s5 }
  0x52   : > { %2701 = sst [smem:[#allocation33_spill]] %s2075_s2 }
  0x53   : > { %2702 = sst [smem:[#allocation34_spill]] %s2078_s4 }
  0x54   : > { %2703 = sst [smem:[#allocation35_spill]] %s2080_s3 }
  0x55   : > { %2704 = sst [smem:[#allocation36_spill]] %s2083_s10 }
  0x56   : > { %2705 = sst [smem:[#allocation37_spill]] %s2085_s7 }
  0x57   : > { %s2088_s9 = sld [smem:[#allocation7 + %s238_s0]] }
  0x58   : > { %s2090_s6 = sld [smem:[#allocation3 + %s238_s0]]  ;;  %s286_s0 = sadd.s32 19, %s2017_s12 }
  0x59   : > { %s2093_s2 = sld [smem:[#allocation7 + %s246_s20]] }
  0x5a   : > { %s2095_s5 = sld [smem:[#allocation3 + %s246_s20]]  ;;  %s294_s20 = sadd.s32 20, %s2017_s12 }
  0x5b   : > { %s2098_s3 = sld [smem:[#allocation7 + %s254_s22]] }
  0x5c   : > { %s2100_s10 = sld [smem:[#allocation3 + %s254_s22]]  ;;  %s302_s22 = sadd.s32 21, %s2017_s12 }
  0x5d   : > { %2706 = sst [smem:[#allocation38_spill]] %s2088_s9 }
  0x5e   : > { %2707 = sst [smem:[#allocation39_spill]] %s2090_s6 }
  0x5f   : > { %2708 = sst [smem:[#allocation40_spill]] %s2093_s2 }
  0x60   : > { %2709 = sst [smem:[#allocation41_spill]] %s2095_s5 }
  0x61   : > { %2710 = sst [smem:[#allocation42_spill]] %s2098_s3 }
  0x62   : > { %2711 = sst [smem:[#allocation43_spill]] %s2100_s10 }
  0x63   : > { %s2103_s7 = sld [smem:[#allocation7 + %s262_s27]] }
  0x64   : > { %s2105_s9 = sld [smem:[#allocation3 + %s262_s27]]  ;;  %s310_s27 = sadd.s32 22, %s2017_s12 }
  0x65   : > { %s2108_s6 = sld [smem:[#allocation7 + %s270_s1]] }
  0x66   : > { %s2110_s2 = sld [smem:[#allocation3 + %s270_s1]] }
  0x67   : > { %s2113_s5 = sld [smem:[#allocation7 + %s278_s18]] }
  0x68   : > { %s2115_s3 = sld [smem:[#allocation3 + %s278_s18]] }
  0x69   : > { %s2118_s10 = sld [smem:[#allocation7 + %s286_s0]]  ;;  %v267_v1 = vstv %s2103_s7 }
  0x6a   : > { %s2120_s4 = sld [smem:[#allocation3 + %s286_s0]] }
  0x6b   : > { %s2123_s13 = sld [smem:[#allocation7 + %s294_s20]]  ;;  %v275_v3 = vstv %s2108_s6  ;;  %s438_s6 = sadd.s32 38, %s2017_s12 }
  0x6c   : > { %s2126_s15 = sld [smem:[#allocation3 + %s294_s20]] }
  0x6d   : > { %s2128_s1 = sld [smem:[#allocation7 + %s302_s22]]  ;;  %v283_v12 = vstv %s2113_s5 }
  0x6e   : > { %s2131_s23 = sld [smem:[#allocation3 + %s302_s22]] }
  0x6f   : > { %s2133_s18 = sld [smem:[#allocation7 + %s310_s27]]  ;;  %v291_v26 = vstv %s2118_s10 }
  0x70   : > { %s2136_s17 = sld [smem:[#allocation3 + %s310_s27]] }
  0x71   : > { %2712 = sst [smem:[#allocation44_spill]] %s2123_s13 }
  0x72   : > { %2713 = sst [smem:[#allocation45_spill]] %s2126_s15 }
  0x73   : > { %2714 = sst [smem:[#allocation46_spill]] %s2128_s1  ;;  %s350_s1 = sadd.s32 27, %s2017_s12 }
  0x74   : > { %2715 = sst [smem:[#allocation47_spill]] %s2131_s23 }
  0x75   : > { %2716 = sst [smem:[#allocation48_spill]] %s2133_s18  ;;  %s358_s18 = sadd.s32 28, %s2017_s12 }
  0x76   : > { %2717 = sst [smem:[#allocation49_spill]] %s2136_s17 }
  0x77   : > { %s2138_s0 = sld [smem:[#allocation7 + %s318_s11]] }
  0x78   : > { %s2141_s13 = sld [smem:[#allocation3 + %s318_s11]] }
  0x79   : > { %s2143_s20 = sld [smem:[#allocation7 + %s326_s14]] }
  0x7a   : > { %s2146_s15 = sld [smem:[#allocation3 + %s326_s14]] }
  0x7b   : > { %s2148_s22 = sld [smem:[#allocation7 + %s334_s16]] }
  0x7c   : > { %s2151_s23 = sld [smem:[#allocation3 + %s334_s16]] }
  0x7d   : > { %2718 = sst [smem:[#allocation50_spill]] %s2138_s0  ;;  %s366_s0 = sadd.s32 29, %s2017_s12 }
  0x7e   : > { %2719 = sst [smem:[#allocation51_spill]] %s2141_s13 }
  0x7f   : > { %2720 = sst [smem:[#allocation52_spill]] %s2143_s20  ;;  %s374_s20 = sadd.s32 30, %s2017_s12 }
  0x80   : > { %2721 = sst [smem:[#allocation53_spill]] %s2146_s15 }
  0x81   : > { %2722 = sst [smem:[#allocation54_spill]] %s2148_s22  ;;  %s382_s22 = sadd.s32 31, %s2017_s12 }
  0x82   : > { %2723 = sst [smem:[#allocation55_spill]] %s2151_s23 }
  0x83   : > { %s2153_s27 = sld [smem:[#allocation7 + %s342_s28]] }
  0x84   : > { %s2156_s17 = sld [smem:[#allocation3 + %s342_s28]] }
  0x85   : > { %s2158_s11 = sld [smem:[#allocation7 + %s350_s1]] }
  0x86   : > { %s2161_s13 = sld [smem:[#allocation3 + %s350_s1]] }
  0x87   : > { %s2163_s14 = sld [smem:[#allocation7 + %s358_s18]] }
  0x88   : > { %s2166_s15 = sld [smem:[#allocation3 + %s358_s18]] }
  0x89   : > { %2724 = sst [smem:[#allocation56_spill]] %s2153_s27  ;;  %s390_s27 = sadd.s32 32, %s2017_s12 }
  0x8a   : > { %s2168_s16 = sld [smem:[#allocation7 + %s366_s0]] }
  0x8b   : > { %2725 = sst [smem:[#allocation57_spill]] %s2158_s11  ;;  %s398_s11 = sadd.s32 33, %s2017_s12 }
  0x8c   : > { %2726 = sst [smem:[#allocation58_spill]] %s2161_s13 }
  0x8d   : > { %2727 = sst [smem:[#allocation59_spill]] %s2163_s14  ;;  %s406_s14 = sadd.s32 34, %s2017_s12 }
  0x8e   : > { %2728 = sst [smem:[#allocation60_spill]] %s2166_s15 }
  0x8f   : > { %s2171_s23 = sld [smem:[#allocation3 + %s366_s0]] }
  0x90   : > { %2729 = sst [smem:[#allocation61_spill]] %s2168_s16  ;;  %s414_s16 = sadd.s32 35, %s2017_s12 }
  0x91   : > { %s2173_s28 = sld [smem:[#allocation7 + %s374_s20]] }
  0x92   : > { %s2176_s1 = sld [smem:[#allocation3 + %s374_s20]] }
  0x93   : > { %s2178_s13 = sld [smem:[#allocation7 + %s382_s22]] }
  0x94   : > { %s2181_s18 = sld [smem:[#allocation3 + %s382_s22]]  ;;  %s273_s22 = scalar_lea.vmem [#allocation9], %s2110_s2 }
  0x95   : > { %2730 = sst [smem:[#allocation62_spill]] %s2171_s23  ;;  %v274_v2 = vld [vmem:[%s273_s22] sm:$0x1] }
  0x96   : > { %s2183_s15 = sld [smem:[#allocation7 + %s390_s27]]  ;;  %v276_v10 = vmul.f32 %v275_v3, %v274_v2 }
  0x97   : > { %2731 = sst [smem:[#allocation63_spill]] %s2173_s28  ;;  %s137_s28 = scalar_lea.vmem [#allocation9], %s2024_s19 }
  0x98   : > { %2732 = sst [smem:[#allocation64_spill]] %s2176_s1  ;;  %v138_v5 = vld [vmem:[%s137_s28] sm:$0x1]  ;;  %s454_s28 = sadd.s32 40, %s2017_s12 }
  0x99   : > { %2733 = sst [smem:[#allocation65_spill]] %s2178_s13  ;;  %s265_s13 = scalar_lea.vmem [#allocation9], %s2105_s9  ;;  %v140_v15 = vmul.f32 %v139_v4, %v138_v5 }
  0x9a   : > { %2734 = sst [smem:[#allocation66_spill]] %s2181_s18  ;;  %v266_v0 = vld [vmem:[%s265_s13] sm:$0x1]  ;;  %s145_s9 = scalar_lea.vmem [#allocation9], %s2029_s21 }
  0x9b   : > { %s2186_s0 = sld [smem:[#allocation3 + %s390_s27]]  ;;  %s430_s27 = sadd.s32 37, %s2017_s12  ;;  %v146_v6 = vld [vmem:[%s145_s9] sm:$0x1]  ;;  %v268_v9 = vmul.f32 %v267_v1, %v266_v0 }
  0x9c   : > { %s2188_s23 = sld [smem:[#allocation7 + %s398_s11]]  ;;  %v395_v8 = vstv %s2183_s15  ;;  %s281_s13 = scalar_lea.vmem [#allocation9], %s2115_s3  ;;  %v148_v16 = vmul.f32 %v147_v7, %v146_v6 }
  0x9d   : > { %s2191_s20 = sld [smem:[#allocation3 + %s398_s11]]  ;;  %v282_v11 = vld [vmem:[%s281_s13] sm:$0x1]  ;;  %s2735_s15 = sadd.s32 36, %s2017_s12  ;;  %v277_v22 = vadd.f32 %v276_v10, %v268_v9 }
  0x9e   : > { %s2197_s18 = sld [smem:[#allocation7 + %s406_s14]]  ;;  %s2736_s8 = smov %s2735_s15  ;;  %v284_v23 = vmul.f32 %v283_v12, %v282_v11  ;;  %v149_v28 = vadd.f32 %v148_v16, %v140_v15 }
  0x9f   : > { %s2201_s1 = sld [smem:[#allocation3 + %s406_s14]]  ;;  %s153_s3 = scalar_lea.vmem [#allocation9], %s2034_s26 }
  0xa0   : > { %s2207_s2 = sld [smem:[#allocation7 + %s414_s16]]  ;;  %v154_v18 = vld [vmem:[%s153_s3] sm:$0x1]  ;;  %s446_s11 = sadd.s32 39, %s2017_s12  ;;  %v285_v36 = vadd.f32 %v284_v23, %v277_v22 }
  0xa1   : > { %s2210_s7 = sld [smem:[#allocation3 + %s414_s16]]  ;;  %s393_s30 = scalar_lea.vmem [#allocation9], %s2186_s0  ;;  %v156_v29 = vmul.f32 %v155_v19, %v154_v18 }
  0xa2   : > { %v394_v13 = vld [vmem:[%s393_s30] sm:$0x1]  ;;  %v403_v14 = vstv %s2188_s23  ;;  %s2218_s19 = sld [smem:[#allocation7 + %s2735_s15]]  ;;  %s289_s26 = scalar_lea.vmem [#allocation9], %s2120_s4 }
  0xa3   : > { %v396_v17 = vmul.f32 %v395_v8, %v394_v13  ;;  %s2222_s21 = sld [smem:[#allocation3 + %s2736_s8]]  ;;  %s401_s5 = scalar_lea.vmem [#allocation9], %s2191_s20  ;;  %v290_v25 = vld [vmem:[%s289_s26] sm:$0x1]  ;;  %v157_v40 = vadd.f32 %v156_v29, %v149_v28 }
  0xa4   : > { %v402_v20 = vld [vmem:[%s401_s5] sm:$0x1]  ;;  %v411_v21 = vstv %s2197_s18  ;;  %s2230_s23 = sld [smem:[#allocation7 + %s430_s27]]  ;;  %s161_s4 = scalar_lea.vmem [#allocation9], %s2039_s29  ;;  %v292_v37 = vmul.f32 %v291_v26, %v290_v25 }
  0xa5   : > { %v404_v24 = vmul.f32 %v403_v14, %v402_v20  ;;  %s2235_s14 = sld [smem:[#allocation3 + %s430_s27]]  ;;  %s409_s24 = scalar_lea.vmem [#allocation9], %s2201_s1  ;;  %v162_v32 = vld [vmem:[%s161_s4] sm:$0x1] }
  0xa6   : > { %v410_v27 = vld [vmem:[%s409_s24] sm:$0x1]  ;;  %s2242_s16 = sld [smem:[#allocation7 + %s438_s6]]  ;;  %v419_v35 = vstv %s2207_s2  ;;  %s462_s27 = sadd.s32 41, %s2017_s12  ;;  %v164_v41 = vmul.f32 %v163_v33, %v162_v32  ;;  %v293_v48 = vadd.f32 %v292_v37, %v285_v36 }
  0xa7   : > { %s2737_s18 = sld [smem:[#allocation45_spill]]  ;;  %v405_v30 = vadd.f32 %v404_v24, %v396_v17  ;;  %v412_v31 = vmul.f32 %v411_v21, %v410_v27  ;;  %s417_s10 = scalar_lea.vmem [#allocation9], %s2210_s7 }
  0xa8   : > { %s2738_s0 = sld [smem:[#allocation44_spill]]  ;;  %v418_v34 = vld [vmem:[%s417_s10] sm:$0x1]  ;;  %s470_s29 = sadd.s32 42, %s2017_s12  ;;  %v427_v47 = vstv %s2218_s19  ;;  %v165_v52 = vadd.f32 %v164_v41, %v157_v40 }
  0xa9   : > { %s2247_s20 = sld [smem:[#allocation3 + %s438_s6]]  ;;  %v413_v42 = vadd.f32 %v412_v31, %v405_v30  ;;  %v420_v43 = vmul.f32 %v419_v35, %v418_v34  ;;  %s478_s15 = sadd.s32 43, %s2017_s12 }
  0xaa   : > { %s2253_s1 = sld [smem:[#allocation7 + %s446_s11]]  ;;  %s425_s3 = scalar_lea.vmem [#allocation9], %s2222_s21  ;;  %v435_v59 = vstv %s2230_s23 }
  0xab   : > { %s2739_s22 = sld [smem:[#allocation21_spill]]  ;;  %v426_v46 = vld [vmem:[%s425_s3] sm:$0x1]  ;;  %s486_s26 = sadd.s32 44, %s2017_s12  ;;  %v421_v54 = vadd.f32 %v420_v43, %v413_v42 }
  0xac   : > { %s2740_s9 = sld [smem:[#allocation20_spill]]  ;;  %s494_s21 = sadd.s32 45, %s2017_s12  ;;  %v428_v55 = vmul.f32 %v427_v47, %v426_v46  ;;  %v443_v7 = vstv %s2242_s16 }
  0xad   : > { %s2256_s13 = sld [smem:[#allocation3 + %s446_s11]]  ;;  %s297_s6 = scalar_lea.vmem [#allocation9], %s2737_s18 }
  0xae   : > { %v298_v38 = vld [vmem:[%s297_s6] sm:$0x1]  ;;  %v299_v39 = vstv %s2738_s0  ;;  %s2260_s25 = sld [smem:[#allocation7 + %s454_s28]]  ;;  %v429_v2 = vadd.f32 %v428_v55, %v421_v54 }
  0xaf   : > { %s2741_s2 = sld [smem:[#allocation47_spill]]  ;;  %v300_v49 = vmul.f32 %v299_v39, %v298_v38 }
  0xb0   : > { %s2742_s7 = sld [smem:[#allocation46_spill]]  ;;  %v451_v19 = vstv %s2253_s1 }
  0xb1   : > { %s2263_s30 = sld [smem:[#allocation3 + %s454_s28]]  ;;  %s169_s8 = scalar_lea.vmem [#allocation9], %s2739_s22  ;;  %v301_v60 = vadd.f32 %v300_v49, %v293_v48 }
  0xb2   : > { %v170_v44 = vld [vmem:[%s169_s8] sm:$0x1]  ;;  %v171_v45 = vstv %s2740_s9  ;;  %s2743_s5 = sld [smem:[#allocation23_spill]] }
  0xb3   : > { %s2270_s11 = sld [smem:[#allocation7 + %s462_s27]]  ;;  %v172_v53 = vmul.f32 %v171_v45, %v170_v44 }
  0xb4   : > { %s2744_s24 = sld [smem:[#allocation22_spill]]  ;;  %v459_v29 = vstv %s2260_s25  ;;  %s2764_s25 = sadd.s32 50, %s2017_s12 }
  0xb5   : > { %s2273_s18 = sld [smem:[#allocation3 + %s462_s27]]  ;;  %s305_s28 = scalar_lea.vmem [#allocation9], %s2741_s2  ;;  %v173_v0 = vadd.f32 %v172_v53, %v165_v52 }
  0xb6   : > { %v306_v50 = vld [vmem:[%s305_s28] sm:$0x1]  ;;  %v307_v51 = vstv %s2742_s7  ;;  %s2277_s0 = sld [smem:[#allocation7 + %s470_s29]]  ;;  %s433_s27 = scalar_lea.vmem [#allocation9], %s2235_s14 }
  0xb7   : > { %s2745_s19 = sld [smem:[#allocation49_spill]]  ;;  %v434_v58 = vld [vmem:[%s433_s27] sm:$0x1]  ;;  %s502_s2 = sadd.s32 46, %s2017_s12  ;;  %v308_v61 = vmul.f32 %v307_v51, %v306_v50 }
  0xb8   : > { %s2746_s4 = sld [smem:[#allocation48_spill]]  ;;  %s177_s22 = scalar_lea.vmem [#allocation9], %s2743_s5  ;;  %v436_v3 = vmul.f32 %v435_v59, %v434_v58 }
  0xb9   : > { %s2280_s10 = sld [smem:[#allocation3 + %s470_s29]]  ;;  %v178_v56 = vld [vmem:[%s177_s22] sm:$0x1]  ;;  %s510_s14 = sadd.s32 47, %s2017_s12  ;;  %v309_v8 = vadd.f32 %v308_v61, %v301_v60  ;;  %v467_v43 = vstv %s2270_s11 }
  0xba   : > { %v179_v57 = vstv %s2744_s24  ;;  %s2747_s9 = sld [smem:[#allocation25_spill]]  ;;  %s441_s28 = scalar_lea.vmem [#allocation9], %s2247_s20  ;;  %v437_v14 = vadd.f32 %v436_v3, %v429_v2 }
  0xbb   : > { %s2288_s6 = sld [smem:[#allocation7 + %s478_s15]]  ;;  %v180_v1 = vmul.f32 %v179_v57, %v178_v56  ;;  %v442_v6 = vld [vmem:[%s441_s28] sm:$0x1]  ;;  %s518_s22 = sadd.s32 48, %s2017_s12 }
  0xbc   : > { %s2748_s7 = sld [smem:[#allocation24_spill]]  ;;  %s526_s20 = sadd.s32 49, %s2017_s12  ;;  %v444_v15 = vmul.f32 %v443_v7, %v442_v6  ;;  %v475_v61 = vstv %s2277_s0 }
  0xbd   : > { %s2293_s29 = sld [smem:[#allocation3 + %s478_s15]]  ;;  %s313_s8 = scalar_lea.vmem [#allocation9], %s2745_s19  ;;  %v181_v12 = vadd.f32 %v180_v1, %v173_v0 }
  0xbe   : > { %v314_v62 = vld [vmem:[%s313_s8] sm:$0x1]  ;;  %v315_v63 = vstv %s2746_s4  ;;  %s2299_s23 = sld [smem:[#allocation7 + %s486_s26]]  ;;  %v445_v26 = vadd.f32 %v444_v15, %v437_v14  ;;  %s345_s11 = scalar_lea.vmem [#allocation9], %s2156_s17 }
  0xbf   : > { %s2749_s3 = sld [smem:[#allocation51_spill]]  ;;  %v316_v9 = vmul.f32 %v315_v63, %v314_v62  ;;  %v346_v50 = vld [vmem:[%s345_s11] sm:$0x1]  ;;  %s2779_s11 = sadd.s32 53, %s2017_s12 }
  0xc0   : > { %s2750_s5 = sld [smem:[#allocation50_spill]]  ;;  %s185_s24 = scalar_lea.vmem [#allocation9], %s2747_s9 }
  0xc1   : > { %s2304_s15 = sld [smem:[#allocation3 + %s486_s26]]  ;;  %v186_v4 = vld [vmem:[%s185_s24] sm:$0x1]  ;;  %v317_v20 = vadd.f32 %v316_v9, %v309_v8 }
  0xc2   : > { %v187_v5 = vstv %s2748_s7  ;;  %s2751_s19 = sld [smem:[#allocation27_spill]] }
  0xc3   : > { %s2312_s4 = sld [smem:[#allocation7 + %s494_s21]]  ;;  %v188_v13 = vmul.f32 %v187_v5, %v186_v4 }
  0xc4   : > { %s2752_s27 = sld [smem:[#allocation26_spill]] }
  0xc5   : > { %s2317_s26 = sld [smem:[#allocation3 + %s494_s21]]  ;;  %s321_s9 = scalar_lea.vmem [#allocation9], %s2749_s3  ;;  %v189_v24 = vadd.f32 %v188_v13, %v181_v12 }
  0xc6   : > { %v322_v10 = vld [vmem:[%s321_s9] sm:$0x1]  ;;  %v323_v11 = vstv %s2750_s5  ;;  %s2323_s16 = sld [smem:[#allocation7 + %s502_s2]]  ;;  %s449_s5 = scalar_lea.vmem [#allocation9], %s2256_s13 }
  0xc7   : > { %s2754_s7 = sld [smem:[#allocation53_spill]]  ;;  %v450_v18 = vld [vmem:[%s449_s5] sm:$0x1]  ;;  %v324_v21 = vmul.f32 %v323_v11, %v322_v10 }
  0xc8   : > { %s2755_s8 = sld [smem:[#allocation52_spill]]  ;;  %s193_s3 = scalar_lea.vmem [#allocation9], %s2751_s19  ;;  %v452_v27 = vmul.f32 %v451_v19, %v450_v18 }
  0xc9   : > { %s2328_s21 = sld [smem:[#allocation3 + %s502_s2]]  ;;  %v194_v16 = vld [vmem:[%s193_s3] sm:$0x1]  ;;  %v325_v32 = vadd.f32 %v324_v21, %v317_v20 }
  0xca   : > { %v195_v17 = vstv %s2752_s27  ;;  %s2336_s24 = sld [smem:[#allocation7 + %s510_s14]]  ;;  %v453_v38 = vadd.f32 %v452_v27, %v445_v26 }
  0xcb   : > { %s2341_s2 = sld [smem:[#allocation3 + %s510_s14]]  ;;  %v196_v25 = vmul.f32 %v195_v17, %v194_v16  ;;  %v483_v16 = vstv %s2288_s6 }
  0xcc   : > { %2753 = sst [smem:[#allocation45_spill]] %s2323_s16 }
  0xcd   : > { %s2758_s19 = sld [smem:[#allocation29_spill]]  ;;  %s329_s9 = scalar_lea.vmem [#allocation9], %s2754_s7  ;;  %v197_v36 = vadd.f32 %v196_v25, %v189_v24 }
  0xce   : > { %v330_v22 = vld [vmem:[%s329_s9] sm:$0x1]  ;;  %s2759_s13 = sld [smem:[#allocation28_spill]]  ;;  %v331_v23 = vstv %s2755_s8  ;;  %s457_s7 = scalar_lea.vmem [#allocation9], %s2263_s30 }
  0xcf   : > { %s2347_s1 = sld [smem:[#allocation7 + %s518_s22]]  ;;  %v458_v28 = vld [vmem:[%s457_s7] sm:$0x1]  ;;  %v332_v33 = vmul.f32 %v331_v23, %v330_v22 }
  0xd0   : > { %2756 = sst [smem:[#allocation44_spill]] %s2336_s24  ;;  %v460_v39 = vmul.f32 %v459_v29, %v458_v28 }
  0xd1   : > { %2757 = sst [smem:[#allocation21_spill]] %s2341_s2  ;;  %s2768_s2 = smov %s2764_s25  ;;  %v333_v48 = vadd.f32 %v332_v33, %v325_v32 }
  0xd2   : > { %s2760_s3 = sld [smem:[#allocation55_spill]]  ;;  %v461_v55 = vadd.f32 %v460_v39, %v453_v38 }
  0xd3   : > { %s2761_s5 = sld [smem:[#allocation54_spill]]  ;;  %s201_s28 = scalar_lea.vmem [#allocation9], %s2758_s19 }
  0xd4   : > { %s2352_s14 = sld [smem:[#allocation3 + %s518_s22]]  ;;  %v202_v30 = vld [vmem:[%s201_s28] sm:$0x1]  ;;  %v203_v31 = vstv %s2759_s13  ;;  %s566_s28 = sadd.s32 54, %s2017_s12 }
  0xd5   : > { %s2762_s9 = sld [smem:[#allocation30_spill]]  ;;  %v204_v40 = vmul.f32 %v203_v31, %v202_v30  ;;  %v523_v44 = vstv %s2347_s1 }
  0xd6   : > { %s2358_s8 = sld [smem:[#allocation7 + %s526_s20]] }
  0xd7   : > { %s2763_s24 = sld [smem:[#allocation32_spill]]  ;;  %v205_v58 = vadd.f32 %v204_v40, %v197_v36 }
  0xd8   : > { %s2365_s22 = sld [smem:[#allocation3 + %s526_s20]]  ;;  %s337_s30 = scalar_lea.vmem [#allocation9], %s2760_s3 }
  0xd9   : > { %v338_v34 = vld [vmem:[%s337_s30] sm:$0x1]  ;;  %v339_v35 = vstv %s2761_s5  ;;  %s2765_s7 = sld [smem:[#allocation31_spill]]  ;;  %s465_s5 = scalar_lea.vmem [#allocation9], %s2273_s18 }
  0xda   : > { %s2371_s27 = sld [smem:[#allocation7 + %s2764_s25]]  ;;  %v466_v42 = vld [vmem:[%s465_s5] sm:$0x1]  ;;  %s2770_s30 = sadd.s32 51, %s2017_s12  ;;  %v340_v49 = vmul.f32 %v339_v35, %v338_v34  ;;  %v491_v35 = vstv %s2299_s23 }
  0xdb   : > { %s2766_s19 = sld [smem:[#allocation34_spill]]  ;;  %v211_v37 = vstv %s2762_s9  ;;  %v468_v56 = vmul.f32 %v467_v43, %v466_v42 }
  0xdc   : > { %s2767_s13 = sld [smem:[#allocation36_spill]]  ;;  %v531_v53 = vstv %s2358_s8  ;;  %v341_v2 = vadd.f32 %v340_v49, %v333_v48 }
  0xdd   : > { %s2377_s20 = sld [smem:[#allocation3 + %s2768_s2]]  ;;  %v219_v41 = vstv %s2763_s24  ;;  %s2772_s24 = smov %s2770_s30  ;;  %v469_v9 = vadd.f32 %v468_v56, %v461_v55  ;;  %v499_v56 = vstv %s2312_s4 }
  0xde   : > { %s2769_s3 = sld [smem:[#allocation56_spill]]  ;;  %s521_s2 = scalar_lea.vmem [#allocation9], %s2352_s14 }
  0xdf   : > { %s2385_s25 = sld [smem:[#allocation7 + %s2770_s30]]  ;;  %s209_s16 = scalar_lea.vmem [#allocation9], %s2765_s7  ;;  %v522_v52 = vld [vmem:[%s521_s2] sm:$0x1] }
  0xe0   : > { %s2771_s9 = sld [smem:[#allocation38_spill]]  ;;  %v210_v45 = vld [vmem:[%s209_s16] sm:$0x1]  ;;  %s2773_s16 = sadd.s32 52, %s2017_s12  ;;  %v524_v57 = vmul.f32 %v523_v44, %v522_v52  ;;  %v539_v63 = vstv %s2371_s27 }
  0xe1   : > { %v227_v46 = vstv %s2766_s19  ;;  %s2393_s18 = sld [smem:[#allocation3 + %s2772_s24]]  ;;  %s2776_s17 = smov %s2773_s16  ;;  %v212_v59 = vmul.f32 %v211_v37, %v210_v45 }
  0xe2   : > { %v235_v47 = vstv %s2767_s13  ;;  %s2401_s1 = sld [smem:[#allocation7 + %s2773_s16]]  ;;  %s529_s24 = scalar_lea.vmem [#allocation9], %s2365_s22 }
  0xe3   : > { %s2774_s7 = sld [smem:[#allocation33_spill]]  ;;  %v530_v62 = vld [vmem:[%s529_s24] sm:$0x1]  ;;  %s574_s16 = sadd.s32 55, %s2017_s12  ;;  %v213_v13 = vadd.f32 %v212_v59, %v205_v58 }
  0xe4   : > { %v347_v51 = vstv %s2769_s3  ;;  %s2775_s5 = sld [smem:[#allocation40_spill]]  ;;  %s473_s3 = scalar_lea.vmem [#allocation9], %s2280_s10  ;;  %v532_v4 = vmul.f32 %v531_v53, %v530_v62 }
  0xe5   : > { %s2406_s30 = sld [smem:[#allocation3 + %s2776_s17]]  ;;  %v474_v60 = vld [vmem:[%s473_s3] sm:$0x1]  ;;  %v348_v3 = vmul.f32 %v347_v51, %v346_v50  ;;  %s2780_s10 = smov %s2779_s11  ;;  %v547_v8 = vstv %s2385_s25 }
  0xe6   : > { %v243_v54 = vstv %s2771_s9  ;;  %s2777_s14 = sld [smem:[#allocation58_spill]]  ;;  %s537_s27 = scalar_lea.vmem [#allocation9], %s2377_s20  ;;  %v476_v10 = vmul.f32 %v475_v61, %v474_v60  ;;  %v533_v11 = vadd.f32 %v532_v4, %v524_v57 }
  0xe7   : > { %s2778_s8 = sld [smem:[#allocation57_spill]]  ;;  %v538_v7 = vld [vmem:[%s537_s27] sm:$0x1]  ;;  %s582_s3 = sadd.s32 56, %s2017_s12  ;;  %v349_v20 = vadd.f32 %v348_v3, %v341_v2 }
  0xe8   : > { %s2414_s2 = sld [smem:[#allocation7 + %s2779_s11]]  ;;  %v540_v12 = vmul.f32 %v539_v63, %v538_v7  ;;  %s545_s11 = scalar_lea.vmem [#allocation9], %s2393_s18  ;;  %v555_v18 = vstv %s2401_s1  ;;  %v477_v28 = vadd.f32 %v476_v10, %v469_v9 }
  0xe9   : > { %s217_s17 = scalar_lea.vmem [#allocation9], %s2774_s7  ;;  %s2421_s0 = sld [smem:[#allocation3 + %s2780_s10]]  ;;  %v546_v17 = vld [vmem:[%s545_s11] sm:$0x1] }
  0xea   : > { %v218_v0 = vld [vmem:[%s217_s17] sm:$0x1]  ;;  %v251_v1 = vstv %s2775_s5  ;;  %s2429_s7 = sld [smem:[#allocation7 + %s566_s28]]  ;;  %v541_v22 = vadd.f32 %v540_v12, %v533_v11  ;;  %v548_v23 = vmul.f32 %v547_v8, %v546_v17 }
  0xeb   : > { %s2781_s24 = sld [smem:[#allocation35_spill]]  ;;  %v220_v14 = vmul.f32 %v219_v41, %v218_v0  ;;  %s553_s18 = scalar_lea.vmem [#allocation9], %s2406_s30 }
  0xec   : > { %s353_s22 = scalar_lea.vmem [#allocation9], %s2777_s14  ;;  %s2434_s14 = sld [smem:[#allocation3 + %s566_s28]]  ;;  %v554_v26 = vld [vmem:[%s553_s18] sm:$0x1]  ;;  %v549_v30 = vadd.f32 %v548_v23, %v541_v22 }
  0xed   : > { %v354_v5 = vld [vmem:[%s353_s22] sm:$0x1]  ;;  %v355_v6 = vstv %s2778_s8  ;;  %s2782_s20 = sld [smem:[#allocation60_spill]]  ;;  %s481_s8 = scalar_lea.vmem [#allocation9], %s2293_s29  ;;  %v556_v31 = vmul.f32 %v555_v18, %v554_v26  ;;  %v221_v32 = vadd.f32 %v220_v14, %v213_v13 }
  0xee   : > { %v482_v15 = vld [vmem:[%s481_s8] sm:$0x1]  ;;  %s2783_s25 = sld [smem:[#allocation59_spill]]  ;;  %s590_s28 = sadd.s32 57, %s2017_s12  ;;  %v356_v21 = vmul.f32 %v355_v6, %v354_v5  ;;  %v563_v27 = vstv %s2414_s2 }
  0xef   : > { %s2442_s17 = sld [smem:[#allocation7 + %s574_s16]]  ;;  %s598_s22 = sadd.s32 58, %s2017_s12  ;;  %v484_v29 = vmul.f32 %v483_v16, %v482_v15  ;;  %v557_v41 = vadd.f32 %v556_v31, %v549_v30 }
  0xf0   : > { %s2448_s6 = sld [smem:[#allocation3 + %s574_s16]]  ;;  %s489_s2 = scalar_lea.vmem [#allocation9], %s2304_s15  ;;  %v571_v37 = vstv %s2429_s7  ;;  %v357_v39 = vadd.f32 %v356_v21, %v349_v20 }
  0xf1   : > { %s225_s10 = scalar_lea.vmem [#allocation9], %s2781_s24  ;;  %s2456_s1 = sld [smem:[#allocation7 + %s582_s3]]  ;;  %v490_v34 = vld [vmem:[%s489_s2] sm:$0x1]  ;;  %v485_v48 = vadd.f32 %v484_v29, %v477_v28 }
  0xf2   : > { %v226_v19 = vld [vmem:[%s225_s10] sm:$0x1]  ;;  %s2784_s27 = sld [smem:[#allocation37_spill]]  ;;  %s569_s19 = scalar_lea.vmem [#allocation9], %s2434_s14  ;;  %v492_v49 = vmul.f32 %v491_v35, %v490_v34 }
  0xf3   : > { %s361_s29 = scalar_lea.vmem [#allocation9], %s2782_s20  ;;  %s2461_s16 = sld [smem:[#allocation3 + %s582_s3]]  ;;  %v228_v33 = vmul.f32 %v227_v46, %v226_v19  ;;  %v570_v45 = vld [vmem:[%s569_s19] sm:$0x1] }
  0xf4   : > { %v362_v24 = vld [vmem:[%s361_s29] sm:$0x1]  ;;  %v363_v25 = vstv %s2783_s25  ;;  %s2785_s30 = sld [smem:[#allocation62_spill]]  ;;  %s561_s20 = scalar_lea.vmem [#allocation9], %s2421_s0  ;;  %v572_v51 = vmul.f32 %v571_v37, %v570_v45  ;;  %v493_v4 = vadd.f32 %v492_v49, %v485_v48 }
  0xf5   : > { %s2786_s24 = sld [smem:[#allocation61_spill]]  ;;  %v562_v36 = vld [vmem:[%s561_s20] sm:$0x1]  ;;  %s606_s3 = sadd.s32 59, %s2017_s12  ;;  %v364_v40 = vmul.f32 %v363_v25, %v362_v24  ;;  %v579_v46 = vstv %s2442_s17  ;;  %v229_v52 = vadd.f32 %v228_v33, %v221_v32 }
  0xf6   : > { %s2471_s8 = sld [smem:[#allocation7 + %s590_s28]]  ;;  %v564_v42 = vmul.f32 %v563_v27, %v562_v36  ;;  %s614_s7 = sadd.s32 60, %s2017_s12 }
  0xf7   : > { %s2477_s23 = sld [smem:[#allocation3 + %s590_s28]]  ;;  %s497_s17 = scalar_lea.vmem [#allocation9], %s2317_s26  ;;  %v587_v58 = vstv %s2456_s1  ;;  %v365_v60 = vadd.f32 %v364_v40, %v357_v39 }
  0xf8   : > { %s233_s25 = scalar_lea.vmem [#allocation9], %s2784_s27  ;;  %s2485_s0 = sld [smem:[#allocation7 + %s598_s22]]  ;;  %v565_v50 = vadd.f32 %v564_v42, %v557_v41  ;;  %v498_v55 = vld [vmem:[%s497_s17] sm:$0x1] }
  0xf9   : > { %v234_v38 = vld [vmem:[%s233_s25] sm:$0x1]  ;;  %s2787_s11 = sld [smem:[#allocation39_spill]]  ;;  %s577_s29 = scalar_lea.vmem [#allocation9], %s2448_s6  ;;  %v500_v5 = vmul.f32 %v499_v56, %v498_v55 }
  0xfa   : > { %s369_s15 = scalar_lea.vmem [#allocation9], %s2785_s30  ;;  %s2490_s28 = sld [smem:[#allocation3 + %s598_s22]]  ;;  %v236_v53 = vmul.f32 %v235_v47, %v234_v38  ;;  %v578_v57 = vld [vmem:[%s577_s29] sm:$0x1]  ;;  %v573_v61 = vadd.f32 %v572_v51, %v565_v50 }
  0xfb   : > { %v370_v43 = vld [vmem:[%s369_s15] sm:$0x1]  ;;  %v371_v44 = vstv %s2786_s24  ;;  %s2788_s14 = sld [smem:[#allocation64_spill]]  ;;  %s622_s22 = sadd.s32 61, %s2017_s12  ;;  %v580_v62 = vmul.f32 %v579_v46, %v578_v57  ;;  %v501_v22 = vadd.f32 %v500_v5, %v493_v4 }
  0xfc   : > { %s2789_s10 = sld [smem:[#allocation63_spill]]  ;;  %v372_v47 = vmul.f32 %v371_v44, %v370_v43  ;;  %s585_s6 = scalar_lea.vmem [#allocation9], %s2461_s16  ;;  %v595_v3 = vstv %s2471_s8  ;;  %v237_v8 = vadd.f32 %v236_v53, %v229_v52 }
  0xfd   : > { %s2500_s18 = sld [smem:[#allocation7 + %s606_s3]]  ;;  %v586_v2 = vld [vmem:[%s585_s6] sm:$0x1]  ;;  %s630_s30 = sadd.s32 62, %s2017_s12  ;;  %v581_v6 = vadd.f32 %v580_v62, %v573_v61  ;;  %v660_v61 = vlaneseq }
  0xfe   : > { %s2506_s4 = sld [smem:[#allocation3 + %s606_s3]]  ;;  %v588_v7 = vmul.f32 %v587_v58, %v586_v2  ;;  %s505_s20 = scalar_lea.vmem [#allocation9], %s2328_s21  ;;  %v603_v13 = vstv %s2485_s0  ;;  %v373_v15 = vadd.f32 %v372_v47, %v365_v60 }
  0xff   : > { %s241_s27 = scalar_lea.vmem [#allocation9], %s2787_s11  ;;  %s2790_s13 = sld [smem:[#allocation45_spill]]  ;;  %v506_v10 = vld [vmem:[%s505_s20] sm:$0x1]  ;;  %vm662_vm3 = vcmp.lt.s32.totalorder %v660_v61, 512 }
 0x100   : > { %v242_v59 = vld [vmem:[%s241_s27] sm:$0x1]  ;;  %s2514_s1 = sld [smem:[#allocation7 + %s614_s7]]  ;;  %s593_s3 = scalar_lea.vmem [#allocation9], %s2477_s23  ;;  %v589_v16 = vadd.f32 %v588_v7, %v581_v6 }
 0x101   : > { %s377_s26 = scalar_lea.vmem [#allocation9], %s2788_s14  ;;  %s2791_s2 = sld [smem:[#allocation41_spill]]  ;;  %v244_v9 = vmul.f32 %v243_v54, %v242_v59  ;;  %v594_v12 = vld [vmem:[%s593_s3] sm:$0x1] }
 0x102   : > { %v378_v63 = vld [vmem:[%s377_s26] sm:$0x1]  ;;  %v379_v0 = vstv %s2789_s10  ;;  %s2519_s24 = sld [smem:[#allocation3 + %s614_s7]]  ;;  %s638_s15 = sadd.s32 63, %s2017_s12  ;;  %v596_v17 = vmul.f32 %v595_v3, %v594_v12 }
 0x103   : > { %s2792_s16 = sld [smem:[#allocation66_spill]]  ;;  %v380_v54 = vmul.f32 %v379_v0, %v378_v63  ;;  %s601_s0 = scalar_lea.vmem [#allocation9], %s2490_s28  ;;  %v611_v21 = vstv %s2500_s18  ;;  %v245_v26 = vadd.f32 %v244_v9, %v237_v8 }
 0x104   : > { %s2793_s8 = sld [smem:[#allocation65_spill]]  ;;  %v602_v20 = vld [vmem:[%s601_s0] sm:$0x1]  ;;  %v597_v24 = vadd.f32 %v596_v17, %v589_v16  ;;  %s609_s29 = scalar_lea.vmem [#allocation9], %s2506_s4 }
 0x105   : > { %v507_v11 = vstv %s2790_s13  ;;  %s2529_s25 = sld [smem:[#allocation7 + %s622_s22]]  ;;  %v604_v25 = vmul.f32 %v603_v13, %v602_v20  ;;  %v610_v30 = vld [vmem:[%s609_s29] sm:$0x1]  ;;  %v381_v32 = vadd.f32 %v380_v54, %v373_v15 }
 0x106   : > { %s2794_s21 = sld [smem:[#allocation21_spill]]  ;;  %v508_v23 = vmul.f32 %v507_v11, %v506_v10  ;;  %v619_v31 = vstv %s2514_s1  ;;  %v612_v35 = vmul.f32 %v611_v21, %v610_v30 }
 0x107   : > { %s249_s19 = scalar_lea.vmem [#allocation9], %s2791_s2  ;;  %s2535_s9 = sld [smem:[#allocation3 + %s622_s22]]  ;;  %v605_v34 = vadd.f32 %v604_v25, %v597_v24 }
 0x108   : > { %v250_v14 = vld [vmem:[%s249_s19] sm:$0x1]  ;;  %s2795_s7 = sld [smem:[#allocation44_spill]]  ;;  %s617_s26 = scalar_lea.vmem [#allocation9], %s2519_s24  ;;  %v509_v39 = vadd.f32 %v508_v23, %v501_v22 }
 0x109   : > { %s385_s23 = scalar_lea.vmem [#allocation9], %s2792_s16  ;;  %s2543_s11 = sld [smem:[#allocation7 + %s630_s30]]  ;;  %v252_v27 = vmul.f32 %v251_v1, %v250_v14  ;;  %v618_v37 = vld [vmem:[%s617_s26] sm:$0x1]  ;;  %v613_v41 = vadd.f32 %v612_v35, %v605_v34 }
 0x10a   : > { %v386_v18 = vld [vmem:[%s385_s23] sm:$0x1]  ;;  %v387_v19 = vstv %s2793_s8  ;;  %s2796_s14 = sld [smem:[#allocation43_spill]]  ;;  %v620_v42 = vmul.f32 %v619_v31, %v618_v37 }
 0x10b   : > { %s2547_s17 = sld [smem:[#allocation3 + %s630_s30]]  ;;  %v388_v33 = vmul.f32 %v387_v19, %v386_v18  ;;  %v627_v38 = vstv %s2529_s25  ;;  %v253_v43 = vadd.f32 %v252_v27, %v245_v26 }
 0x10c   : > { %s2797_s10 = sld [smem:[#allocation42_spill]]  ;;  %s513_s28 = scalar_lea.vmem [#allocation9], %s2794_s21  ;;  %v621_v49 = vadd.f32 %v620_v42, %v613_v41 }
 0x10d   : > { %v514_v28 = vld [vmem:[%s513_s28] sm:$0x1]  ;;  %s2557_s18 = sld [smem:[#allocation7 + %s638_s15]]  ;;  %s625_s4 = scalar_lea.vmem [#allocation9], %s2535_s9  ;;  %v389_v48 = vadd.f32 %v388_v33, %v381_v32 }
 0x10e   : > { %v515_v29 = vstv %s2795_s7  ;;  %s640_s5 = sld [smem:[#allocation3 + %s638_s15]]  ;;  %v626_v44 = vld [vmem:[%s625_s4] sm:$0x1] }
 0x10f   : > { %s2798_s27 = sld [smem:[#allocation19_spill]]  ;;  %v516_v40 = vmul.f32 %v515_v29, %v514_v28  ;;  %v635_v45 = vstv %s2543_s11  ;;  %v628_v50 = vmul.f32 %v627_v38, %v626_v44  ;;  %v650_v47 = vrot.slane %v389_v48, 7 }
 0x110   : > { %s257_s22 = scalar_lea.vmem [#allocation9], %s2796_s14 }
 0x111   : > { %v258_v1 = vld [vmem:[%s257_s22] sm:$0x1]  ;;  %s633_s13 = scalar_lea.vmem [#allocation9], %s2547_s17  ;;  %v517_v53 = vadd.f32 %v516_v40, %v509_v39  ;;  %v629_v55 = vadd.f32 %v628_v50, %v621_v49 }
 0x112   : > { %v259_v36 = vstv %s2797_s10  ;;  %v634_v51 = vld [vmem:[%s633_s13] sm:$0x1] }
 0x113   : > { %v260_v46 = vmul.f32 %v259_v36, %v258_v1  ;;  %v643_v52 = vstv %s2557_s18  ;;  %v636_v56 = vmul.f32 %v635_v45, %v634_v51  ;;  %v651_v63 = vrot.slane %v517_v53, 6 }
 0x114   : > { %s641_s6 = scalar_lea.vmem [#allocation9], %s640_s5 }
 0x115   : > { %s664_s12 = sshra.s32 %s2798_s27, 3  ;;  %v642_v57 = vld [vmem:[%s641_s6] sm:$0x1]  ;;  %s667_s1 = sand.u32 7, %s2798_s27  ;;  %v261_v58 = vadd.f32 %v260_v46, %v253_v43  ;;  %v637_v59 = vadd.f32 %v636_v56, %v629_v55 }
 0x116   : > { %s1668_s30 = sshll.u32 %s664_s12, 5  ;;  %v644_v60 = vmul.f32 %v643_v52, %v642_v57  ;;  %s132_s3 = sadd.s32 1, %s2798_s27  }
 0x117   : > { %s670_s2 = sadd.s32 %s1668_s30, %s667_s1  ;;  %v654_v2 = vsel %vm653_vm0, %v261_v58, %v650_v47  ;;  %p129_p0 = scmp.ge.s32.totalorder %s132_s3, 16  }
 0x118   : > { %v645_v62 = vadd.f32 %v644_v60, %v637_v59  ;;  %s671_s24 = scalar_lea.vmem [#allocation2], %s670_s2  ;;  %s2799_s8 = sld [smem:[#allocation69_spill]] (%p129_p0)  ;;  %vm688_vm4 = vcmask (%p129_p0), 1043456   ;;  %vm681_vm5 = vcmask (%p129_p0), 31744   ;;  %v1676_v7 = vld [vmem:[#allocation10 + $0x38] sm:$0xff] (%p129_p0)  ;;  %v1675_v11 = vld [vmem:[#allocation10 + $0x30] sm:$0xff] (%p129_p0) }
 0x119   :  { %s2800_s19 = sld [smem:[#allocation68_spill]] (%p129_p0)  ;;  %v1684_v8 = vld [vmem:[#allocation10 + $0x78] sm:$0xff] (%p129_p0)  ;;  %1048 = vmatpush.bf16.msra.mxu1 (%p129_p0), %v1676_v7  ;;  %v1683_v12 = vld [vmem:[#allocation10 + $0x70] sm:$0xff] (%p129_p0)  ;;  %v1674_v15 = vld [vmem:[#allocation10 + $0x28] sm:$0xff] (%p129_p0)  ;;  %s1907_s15 = smov (%p129_p0), [#allocation13]  }
 0x11a   : > { %v652_v0 = vrot.slane %v645_v62, 5  ;;  %131 = sbr.rel (!%p129_p0) target bundleno = 42 (0x2a), region = 176  ;;  %v1692_v9 = vld [vmem:[#allocation10 + $0xb8] sm:$0xff] (%p129_p0)  ;;  %1062 = vmatpush.bf16.msra.mxu2 (%p129_p0), %v1684_v8  ;;  %v1691_v13 = vld [vmem:[#allocation10 + $0xb0] sm:$0xff] (%p129_p0)  ;;  %v1682_v16 = vld [vmem:[#allocation10 + $0x68] sm:$0xff] (%p129_p0)  ;;  %s2801_s7 = sld [smem:[#allocation70_spill]] (%p129_p0) }
 0x11b   :  { %v1700_v10 = vld [vmem:[#allocation10 + $0xf8] sm:$0xff] (%p129_p0)  ;;  %1076 = vmatpush.bf16.msra.mxu3 (%p129_p0), %v1692_v9  ;;  %v1699_v14 = vld [vmem:[#allocation10 + $0xf0] sm:$0xff] (%p129_p0)  ;;  %v1690_v17 = vld [vmem:[#allocation10 + $0xa8] sm:$0xff] (%p129_p0)  ;;  %s2802_s14 = sld [smem:[#allocation73_spill]] (%p129_p0)  ;;  %s2812_s0 = smov (%p129_p0), 128  }
 0x11c   : > { %v656_v3 = vsel %vm655_vm1, %v651_v63, %v652_v0  ;;  %v1698_v18 = vld [vmem:[#allocation10 + $0xe8] sm:$0xff] (%p129_p0)  ;;  %v1673_v19 = vld [vmem:[#allocation10 + $0x20] sm:$0xff] (%p129_p0)  ;;  %v1672_v23 = vld [vmem:[#allocation10 + $0x18] sm:$0xff] (%p129_p0)  ;;  %s2803_s28 = sld [smem:[#allocation71_spill]] (%p129_p0) }
 0x11d   : > { %v658_v4 = vsel %vm657_vm2, %v654_v2, %v656_v3  ;;  %1049 = vmatpush.bf16.msra.mxu1 (%p129_p0), %v1675_v11  ;;  %v1681_v20 = vld [vmem:[#allocation10 + $0x60] sm:$0xff] (%p129_p0)  ;;  %v1680_v24 = vld [vmem:[#allocation10 + $0x58] sm:$0xff] (%p129_p0)  ;;  %v1671_v27 = vld [vmem:[#allocation10 + $0x10] sm:$0xff] (%p129_p0)  ;;  %s2804_s5 = sld [smem:[#allocation72_spill]] (%p129_p0) }
 0x11e   : > { %672 = vst.msk [vmem:[%s671_s24] ss:$8 sm:$0xf] %vm662_vm3, %v658_v4  ;;  %v676_v5 = vld [vmem:[%s2799_s8] sm:$0xf] (%p129_p0)  ;;  %1063 = vmatpush.bf16.msra.mxu2 (%p129_p0), %v1683_v12  ;;  %v1688_v25 = vld [vmem:[#allocation10 + $0x98] sm:$0xff] (%p129_p0) }
 0x11f   :  { %v674_v6 = vld [vmem:[%s2800_s19] sm:$0xff]  ;;  %1473 = vmatpush.msk.msra.mxu0 %vm688_vm4, %v676_v5  ;;  %1077 = vmatpush.bf16.msra.mxu3 %v1691_v13  ;;  %v675_v54 = vld [vmem:[%s2800_s19 + $0x8] sm:$0xff]  ;;  %v1696_v26 = vld [vmem:[#allocation10 + $0xd8] sm:$0xff]  ;;  %s2805_s26 = sld [smem:[#allocation74_spill]]  ;;  %s1380_s19 = sshll.u32 %s1907_s15, 4  ;;  %s1381_s19 = int_to_ptr.vmem [resolvable:$true] %s1380_s19 }
 0x120   :  { %1474 = vmatmul.msk.f32.vlgmr.msra.gmra.mxu0 %vm681_vm5, %v674_v6  ;;  %v1689_v21 = vld [vmem:[#allocation10 + $0xa0] sm:$0xff]  ;;  %v1679_v28 = vld [vmem:[#allocation10 + $0x50] sm:$0xff]  ;;  %v1670_v31 = vld [vmem:[#allocation10 + $0x8] sm:$0xff]  ;;  %s2806_s13 = sld [smem:[#allocation75_spill]] }
 0x121   :  { %1090 = vmatpush.bf16.msrb.mxu0 %v1700_v10  ;;  %1050 = vmatpush.bf16.msra.mxu1 %v1674_v15  ;;  %v1697_v22 = vld [vmem:[#allocation10 + $0xe0] sm:$0xff]  ;;  %v1687_v29 = vld [vmem:[#allocation10 + $0x90] sm:$0xff]  ;;  %v1678_v32 = vld [vmem:[#allocation10 + $0x48] sm:$0xff]  ;;  %v1906_v10 = vmov 128.0   ;;  %s2807_s30 = sld [smem:[#allocation76_spill]] }
 0x122   :  { %1064 = vmatpush.bf16.msra.mxu2 %v1682_v16  ;;  %v1695_v30 = vld [vmem:[#allocation10 + $0xd0] sm:$0xff]  ;;  %v1686_v33 = vld [vmem:[#allocation10 + $0x88] sm:$0xff]  ;;  %v1669_v35 = vld [vmem:[#allocation10] sm:$0xff]  ;;  %1745 = vrcp.f32 %v1906_v10  ;;  %s2808_s16 = sld [smem:[#allocation77_spill]] }
 0x123   :  { %1078 = vmatpush.bf16.msra.mxu3 %v1690_v17  ;;  %v1694_v34 = vld [vmem:[#allocation10 + $0xc8] sm:$0xff]  ;;  %v1677_v1 = vld [vmem:[#allocation10 + $0x40] sm:$0xff]  ;;  %s2809_s25 = sld [smem:[#allocation78_spill]] }
 0x124   :  { %v1685_v36 = vld [vmem:[#allocation10 + $0x80] sm:$0xff]  ;;  %s2810_s9 = sld [smem:[#allocation79_spill]] }
 0x125   :  { %1091 = vmatpush.bf16.msrb.mxu0 %v1699_v14  ;;  %1051 = vmatpush.bf16.msra.mxu1 %v1673_v19  ;;  %v776_v37 = vld [vmem:[#allocation2] sm:$0xff]  ;;  %v777_v39 = vld [vmem:[#allocation2 + $0x8] sm:$0xff]  ;;  %v778_v41 = vld [vmem:[#allocation2 + $0x10] sm:$0xff] }
 0x126   :  { %1065 = vmatpush.bf16.msra.mxu2 %v1681_v20  ;;  %v780_v38 = vld [vmem:[#allocation2 + $0x20] sm:$0xff]  ;;  %v781_v40 = vld [vmem:[#allocation2 + $0x28] sm:$0xff]  ;;  %v782_v42 = vld [vmem:[#allocation2 + $0x30] sm:$0xff] }
 0x127   :  { %1079 = vmatpush.bf16.msra.mxu3 %v1689_v21  ;;  %v1693_v43 = vld [vmem:[#allocation10 + $0xc0] sm:$0xff]  ;;  %v779_v44 = vld [vmem:[#allocation2 + $0x18] sm:$0xff]  ;;  %v784_v46 = vpack.c.bf16 %v780_v38, %v776_v37  ;;  %v785_v48 = vpack.c.bf16 %v781_v40, %v777_v39  ;;  %v786_v49 = vpack.c.bf16 %v782_v42, %v778_v41  ;;  %v1702_v37 = vld [vmem:[#allocation12 + $0x8] sm:$0xff] }
 0x128   :  { %1475 = vmatmul.msk.f32.gmra.mxu0 %vm681_vm5, %v675_v54  ;;  %v783_v45 = vld [vmem:[#allocation2 + $0x38] sm:$0xff]  ;;  %v1736_v51 = vld [vmem:[%s2801_s7] ss:$0 sm:$0xff]  ;;  %v1746_v11 = vpop.eup %1745  ;;  %s2811_s7 = smov 8  }
 0x129   :  { %1092 = vmatpush.bf16.msrb.mxu0 %v1698_v18  ;;  %1052 = vmatpush.bf16.msra.mxu1 %v1672_v23  ;;  %v787_v50 = vpack.c.bf16 %v783_v45, %v779_v44  ;;  %v1737_v57 = vld [vmem:[%s2802_s14] ss:$0 sm:$0xff]  ;;  %v722_v12 = vmul.f32 128.0, %v1746_v11  ;;  %vm726_vm6 = vweird.f32 %v1746_v11 }
 0x12a   :  { %1066 = vmatpush.bf16.msra.mxu2 %v1680_v24  ;;  %v1701_v41 = vld [vmem:[#allocation12] sm:$0xff]  ;;  %s1382_s23 = sshll.u32 %s2810_s9, 4  ;;  %s1383_s23 = int_to_ptr.hbm [resolvable:$true] %s1382_s23 }
 0x12b   :  { %1080 = vmatpush.bf16.msra.mxu3 %v1688_v25  ;;  %v723_v13 = vsub.f32 1.0, %v722_v12  ;;  %v1711_v12 = vld [vmem:[#allocation12 + $0x50] sm:$0xff] }
 0x12d   :  { %1093 = vmatpush.bf16.msrb.mxu0 %v1697_v22  ;;  %1053 = vmatpush.bf16.msra.mxu1 %v1671_v27  ;;  %v724_v14 = vmul.f32 %v1746_v11, %v723_v13 }
 0x12e   :  { %1067 = vmatpush.bf16.msra.mxu2 %v1679_v28 }
 0x12f   :  { %1081 = vmatpush.bf16.msra.mxu3 %v1687_v29  ;;  %v725_v15 = vadd.f32 %v1746_v11, %v724_v14  ;;  %v1710_v14 = vld [vmem:[#allocation12 + $0x48] sm:$0xff] }
 0x131   :  { %1094 = vmatpush.bf16.msrb.mxu0 %v1696_v26  ;;  %1054 = vmatpush.bf16.msra.mxu1 %v1670_v31  ;;  %v2591_v54 = vsel %vm726_vm6, %v1746_v11, %v725_v15 }
 0x132   :  { %1068 = vmatpush.bf16.msra.mxu2 %v1678_v32  ;;  %v1708_v32 = vld [vmem:[#allocation12 + $0x38] sm:$0xff] }
 0x133   :  { %1082 = vmatpush.bf16.msra.mxu3 %v1686_v33  ;;  %v1707_v33 = vld [vmem:[#allocation12 + $0x30] sm:$0xff] }
 0x135   :  { %1095 = vmatpush.bf16.msrb.mxu0 %v1695_v30  ;;  %1055 = vmatpush.bf16.msra.mxu1 %v1669_v35  ;;  %v1705_v35 = vld [vmem:[#allocation12 + $0x20] sm:$0xff] }
 0x136   :  { %1069 = vmatpush.bf16.msra.mxu2 %v1677_v1  ;;  %v1704_v1 = vld [vmem:[#allocation12 + $0x18] sm:$0xff] }
 0x137   :  { %1083 = vmatpush.bf16.msra.mxu3 %v1685_v36  ;;  %v1703_v36 = vld [vmem:[#allocation12 + $0x10] sm:$0xff] }
 0x138   :  { %1056 = vmatmul.bf16.vlgmr.msra.gmra.mxu1 %v784_v46 }
 0x139   :  { %1096 = vmatpush.bf16.msrb.mxu0 %v1694_v34  ;;  %1070 = vmatmul.bf16.vlgmr.msra.gmra.mxu2 %v785_v48  ;;  %v1706_v34 = vld [vmem:[#allocation12 + $0x28] sm:$0xff] }
 0x13a   :  { %1084 = vmatmul.bf16.vlgmr.msra.gmra.mxu3 %v786_v49  ;;  %1292 = vmatpush.bf16.msrb.mxu1 %v1708_v32 }
 0x13d   :  { %1097 = vmatpush.bf16.msrb.mxu0 %v1693_v43 }
 0x13e   :  { %1293 = vmatpush.bf16.msrb.mxu1 %v1707_v33 }
 0x140   :  { %1098 = vmatmul.bf16.vlgmr.msrb.gmra.mxu0 %v787_v50 }
 0x142   :  { %1294 = vmatpush.bf16.msrb.mxu1 %v1706_v34 }
 0x146   :  { %1295 = vmatpush.bf16.msrb.mxu1 %v1705_v35 }
 0x14a   :  { %1296 = vmatpush.bf16.msrb.mxu1 %v1704_v1  ;;  %v1740_v1 = vld [vmem:[%s2805_s26] ss:$0 sm:$0xff] }
 0x14e   :  { %1297 = vmatpush.bf16.msrb.mxu1 %v1703_v36 }
 0x152   :  { %1298 = vmatpush.bf16.msrb.mxu1 %v1702_v37 }
 0x156   :  { %1299 = vmatpush.bf16.msrb.mxu1 %v1701_v41 }
 0x19d   :  { %v709_v52 = vpop.f32.mrf.mxu0 }
 0x19e   :  { %v710_v53 = vadd.f32 %v1736_v51, %v709_v52 }
 0x1a0   :  { %717 = vadd.xlane.f32.xlu1 %v710_v53 }
 0x1a5   :  { %v712_v55 = vpop.f32.mrf.mxu0 }
 0x1a6   :  { %v713_v56 = vadd.f32 %v1736_v51, %v712_v55  ;;  %v1716_v51 = vld [vmem:[#allocation12 + $0x78] sm:$0xff] }
 0x1a7   :  { %1306 = vmatpush.bf16.msrb.mxu2 %v1716_v51 }
 0x1a8   :  { %719 = vadd.xlane.f32.xlu1 %v713_v56 }
 0x1b5   :  { %v1057_v58 = vpop.f32.mrf.mxu1 }
 0x1b6   :  { %v1058_v59 = vadd.f32 %v1737_v57, %v1057_v58  ;;  %v1715_v58 = vld [vmem:[#allocation12 + $0x70] sm:$0xff] }
 0x1b7   :  { %1307 = vmatpush.bf16.msrb.mxu2 %v1715_v58 }
 0x1bc   :  { %v1071_v60 = vpop.f32.mrf.mxu2 }
 0x1bd   :  { %v1085_v47 = vpop.f32.mrf.mxu3  ;;  %v1072_v61 = vadd.f32 %v1071_v60, %v1058_v59  ;;  %v1099_v62 = vpop.f32.mrf.mxu0 }
 0x1be   :  { %v1059_v0 = vpop.f32.mrf.mxu1 }
 0x1bf   :  { %v1086_v63 = vadd.f32 %v1085_v47, %v1072_v61  ;;  %v1060_v3 = vadd.f32 %v1737_v57, %v1059_v0  ;;  %v1738_v47 = vld [vmem:[%s2803_s28] ss:$0 sm:$0xff] }
 0x1c1   :  { %v1100_v2 = vadd.f32 %v1099_v62, %v1086_v63  ;;  %v1714_v62 = vld [vmem:[#allocation12 + $0x68] sm:$0xff] }
 0x1c2   :  { %1308 = vmatpush.bf16.msrb.mxu2 %v1714_v62 }
 0x1c3   :  { %1106 = vadd.xlane.f32.xlu0 %v1100_v2 }
 0x1c4   :  { %v1073_v4 = vpop.f32.mrf.mxu2 }
 0x1c5   :  { %v1074_v5 = vadd.f32 %v1073_v4, %v1060_v3  ;;  %v1087_v6 = vpop.f32.mrf.mxu3  ;;  %v1101_v8 = vpop.f32.mrf.mxu0  ;;  %v1713_v4 = vld [vmem:[#allocation12 + $0x60] sm:$0xff] }
 0x1c6   :  { %1309 = vmatpush.bf16.msrb.mxu2 %v1713_v4 }
 0x1c7   :  { %v1088_v7 = vadd.f32 %v1087_v6, %v1074_v5 }
 0x1c9   :  { %v1102_v9 = vadd.f32 %v1101_v8, %v1088_v7  ;;  %v1712_v8 = vld [vmem:[#allocation12 + $0x58] sm:$0xff] }
 0x1ca   :  { %1310 = vmatpush.bf16.msrb.mxu2 %v1712_v8 }
 0x1cb   :  { %1108 = vadd.xlane.f32.xlu0 %v1102_v9 }
 0x1ce   :  { %1311 = vmatpush.bf16.msrb.mxu2 %v1711_v12 }
 0x1d2   :  { %1312 = vmatpush.bf16.msrb.mxu2 %v1710_v14 }
 0x213   :  { %v718_v16 = vpop.xlane.xlu1 %717 }
 0x214   :  { %v728_v17 = vmul.f32 %v2591_v54, %v718_v16 }
 0x216   :  { %v730_v18 = vsub.f32 %v710_v53, %v728_v17  ;;  %v1709_v17 = vld [vmem:[#allocation12 + $0x40] sm:$0xff] }
 0x217   :  { %1313 = vmatpush.bf16.msrb.mxu2 %v1709_v17 }
 0x218   :  { %v732_v19 = vmul.f32 %v730_v18, %v730_v18 }
 0x21a   :  { %734 = vadd.xlane.f32.xlu0 %v732_v19 }
 0x21b   :  { %v720_v20 = vpop.xlane.xlu1 %719 }
 0x21c   :  { %v729_v21 = vmul.f32 %v2591_v54, %v720_v20 }
 0x21e   :  { %v2595_v22 = vsub.f32 %v713_v56, %v729_v21 }
 0x220   :  { %v733_v23 = vmul.f32 %v2595_v22, %v2595_v22 }
 0x222   :  { %736 = vadd.xlane.f32.xlu1 %v733_v23 }
 0x236   :  { %v1107_v24 = vpop.xlane.xlu0 %1106 }
 0x237   :  { %v1110_v25 = vmul.f32 %v1107_v24, %v2591_v54 }
 0x239   :  { %v2600_v26 = vsub.f32 %v1100_v2, %v1110_v25  ;;  %v1739_v2 = vld [vmem:[%s2804_s5] ss:$0 sm:$0xff] }
 0x23b   :  { %v1114_v27 = vmul.f32 %v2600_v26, %v2600_v26 }
 0x23d   :  { %1116 = vadd.xlane.f32.xlu2 %v1114_v27 }
 0x23e   :  { %v1109_v28 = vpop.xlane.xlu0 %1108 }
 0x23f   :  { %v1111_v29 = vmul.f32 %v1109_v28, %v2591_v54 }
 0x241   :  { %v2605_v30 = vsub.f32 %v1102_v9, %v1111_v29 }
 0x243   :  { %v1115_v31 = vmul.f32 %v2605_v30, %v2605_v30 }
 0x245   :  { %1118 = vadd.xlane.f32.xlu2 %v1115_v31 }
 0x28d   :  { %v735_v38 = vpop.xlane.xlu0 %734 }
 0x28e   :  { %v738_v39 = vmul.f32 %v735_v38, %v2591_v54 }
 0x290   :  { %v740_v40 = vadd.f32 1e-05, %v738_v39  ;;  %v1741_v39 = vld [vmem:[%s2806_s13] ss:$0 sm:$0xff] }
 0x292   :  { %1747 = vrsqrt.f32 %v740_v40  ;;  %vm748_vm8 = vweird.f32 %v740_v40 }
 0x295   :  { %v737_v42 = vpop.xlane.xlu1 %736 }
 0x296   :  { %v739_v43 = vmul.f32 %v737_v42, %v2591_v54 }
 0x298   :  { %v1748_v44 = vpop.eup %1747  ;;  %v741_v45 = vadd.f32 1e-05, %v739_v43 }
 0x299   :  { %v743_v46 = vmul.f32 %v1748_v44, %v740_v40  ;;  %vm749_vm7 = vweird.f32 %v1748_v44 }
 0x29a   :  { %1749 = vrsqrt.f32 %v741_v45  ;;  %vm750_vm9 = vmor %vm748_vm8, %vm749_vm7  ;;  %vm758_vm11 = vweird.f32 %v741_v45 }
 0x29b   :  { %v744_v48 = vmul.f32 %v1748_v44, %v743_v46 }
 0x29d   :  { %v745_v49 = vmul.f32 0.5, %v744_v48 }
 0x29f   :  { %v746_v50 = vsub.f32 1.5, %v745_v49  ;;  %v1742_v49 = vld [vmem:[%s2807_s30] ss:$0 sm:$0xff] }
 0x2a0   :  { %v1750_v52 = vpop.eup %1749 }
 0x2a1   :  { %v747_v53 = vmul.f32 %v1748_v44, %v746_v50  ;;  %v753_v55 = vmul.f32 %v1750_v52, %v741_v45  ;;  %vm759_vm10 = vweird.f32 %v1750_v52 }
 0x2a2   :  { %vm760_vm12 = vmor %vm758_vm11, %vm759_vm10 }
 0x2a3   :  { %v751_v56 = vsel %vm750_vm9, %v1748_v44, %v747_v53  ;;  %v754_v57 = vmul.f32 %v1750_v52, %v753_v55 }
 0x2a4   :  { %v762_v60 = vmul.f32 %v751_v56, %v730_v18 }
 0x2a5   :  { %v755_v59 = vmul.f32 0.5, %v754_v57 }
 0x2a6   :  { %v767_v0 = vmul.f32 %v1738_v47, %v762_v60 }
 0x2a7   :  { %v756_v61 = vsub.f32 1.5, %v755_v59 }
 0x2a8   :  { %v772_v7 = vadd.f32 %v1739_v2, %v767_v0 }
 0x2a9   :  { %v757_v63 = vmul.f32 %v1750_v52, %v756_v61 }
 0x2aa   :  { %v774_v10 = vmax.f32 %v772_v7, 0.0 }
 0x2ab   :  { %v761_v3 = vsel %vm760_vm12, %v1750_v52, %v757_v63 }
 0x2ac   :  { %v763_v5 = vmul.f32 %v761_v3, %v2595_v22 }
 0x2ae   :  { %v768_v6 = vmul.f32 %v1738_v47, %v763_v5 }
 0x2b0   :  { %v773_v9 = vadd.f32 %v1739_v2, %v768_v6  ;;  %v1117_v15 = vpop.xlane.xlu2 %1116 }
 0x2b1   :  { %v1120_v16 = vmul.f32 %v1117_v15, %v2591_v54  ;;  %v1743_v15 = vld [vmem:[%s2808_s16] ss:$0 sm:$0xff] }
 0x2b2   :  { %v775_v11 = vmax.f32 %v773_v9, 0.0 }
 0x2b3   :  { %v1122_v18 = vadd.f32 1e-05, %v1120_v16 }
 0x2b4   :  { %v1158_v13 = vpack.c.bf16 %v775_v11, %v774_v10 }
 0x2b5   :  { %1751 = vrsqrt.f32 %v1122_v18  ;;  %vm1130_vm14 = vweird.f32 %v1122_v18 }
 0x2b6   :  { %1300 = vmatmul.bf16.vlgmr.msrb.gmra.mxu1 %v1158_v13 }
 0x2b8   :  { %v1119_v19 = vpop.xlane.xlu2 %1118 }
 0x2b9   :  { %v1121_v20 = vmul.f32 %v1119_v19, %v2591_v54 }
 0x2bb   :  { %v1752_v21 = vpop.eup %1751  ;;  %v1123_v22 = vadd.f32 1e-05, %v1121_v20 }
 0x2bc   :  { %v1125_v23 = vmul.f32 %v1752_v21, %v1122_v18  ;;  %vm1131_vm13 = vweird.f32 %v1752_v21  ;;  %v1744_v18 = vld [vmem:[%s2809_s25] ss:$0 sm:$0xff] }
 0x2bd   :  { %1753 = vrsqrt.f32 %v1123_v22  ;;  %vm1132_vm15 = vmor %vm1130_vm14, %vm1131_vm13  ;;  %vm1140_vm1 = vweird.f32 %v1123_v22 }
 0x2be   :  { %v1126_v24 = vmul.f32 %v1752_v21, %v1125_v23 }
 0x2c0   :  { %v1127_v25 = vmul.f32 0.5, %v1126_v24 }
 0x2c2   :  { %v1128_v27 = vsub.f32 1.5, %v1127_v25 }
 0x2c3   :  { %v1754_v28 = vpop.eup %1753 }
 0x2c4   :  { %v1129_v29 = vmul.f32 %v1752_v21, %v1128_v27  ;;  %v1135_v31 = vmul.f32 %v1754_v28, %v1123_v22  ;;  %vm1141_vm0 = vweird.f32 %v1754_v28 }
 0x2c5   :  { %vm1142_vm2 = vmor %vm1140_vm1, %vm1141_vm0 }
 0x2c6   :  { %v1133_v32 = vsel %vm1132_vm15, %v1752_v21, %v1129_v29  ;;  %v1136_v33 = vmul.f32 %v1754_v28, %v1135_v31 }
 0x2c7   :  { %v1144_v35 = vmul.f32 %v1133_v32, %v2600_v26 }
 0x2c8   :  { %v1137_v34 = vmul.f32 0.5, %v1136_v33 }
 0x2c9   :  { %v1149_v38 = vmul.f32 %v1740_v1, %v1144_v35 }
 0x2ca   :  { %v1138_v36 = vsub.f32 1.5, %v1137_v34 }
 0x2cb   :  { %v1154_v43 = vadd.f32 %v1741_v39, %v1149_v38 }
 0x2cc   :  { %v1139_v37 = vmul.f32 %v1754_v28, %v1138_v36 }
 0x2cd   :  { %v1156_v44 = vmax.f32 %v1154_v43, 0.0 }
 0x2ce   :  { %v1143_v40 = vsel %vm1142_vm2, %v1754_v28, %v1139_v37 }
 0x2cf   :  { %v1145_v41 = vmul.f32 %v1143_v40, %v2605_v30 }
 0x2d1   :  { %v1150_v42 = vmul.f32 %v1740_v1, %v1145_v41 }
 0x2d3   :  { %v1155_v26 = vadd.f32 %v1741_v39, %v1150_v42 }
 0x2d5   :  { %v1157_v45 = vmax.f32 %v1155_v26, 0.0 }
 0x2d7   :  { %v1159_v46 = vpack.c.bf16 %v1157_v45, %v1156_v44 }
 0x2d9   :  { %1314 = vmatmul.bf16.vlgmr.msrb.gmra.mxu2 %v1159_v46 }
 0x333   :  { %v1301_v48 = vpop.f32.mrf.mxu1 }
 0x334   :  { %v1302_v50 = vadd.f32 %v1742_v49, %v1301_v48 }
 0x33b   :  { %v1303_v53 = vpop.f32.mrf.mxu1 }
 0x33c   :  { %v1304_v55 = vadd.f32 %v1742_v49, %v1303_v53 }
 0x35c   :  { %v1315_v51 = vpop.f32.mrf.mxu2 }
 0x35d   :  { %v1316_v52 = vadd.f32 %v1315_v51, %v1302_v50 }
 0x35f   :  { %1322 = vadd.xlane.f32.xlu2 %v1316_v52 }
 0x364   :  { %v1317_v56 = vpop.f32.mrf.mxu2 }
 0x365   :  { %v1318_v30 = vadd.f32 %v1317_v56, %v1304_v55 }
 0x367   :  { %1324 = vadd.xlane.f32.xlu0 %v1318_v30 }
 0x3d2   :  { %v1323_v57 = vpop.xlane.xlu2 %1322 }
 0x3d3   :  { %v1326_v58 = vmul.f32 %v1323_v57, %v2591_v54 }
 0x3d5   :  { %v1328_v59 = vsub.f32 %v1316_v52, %v1326_v58 }
 0x3d7   :  { %v1330_v60 = vmul.f32 %v1328_v59, %v1328_v59 }
 0x3d9   :  { %1332 = vadd.xlane.f32.xlu1 %v1330_v60 }
 0x3da   :  { %v1325_v47 = vpop.xlane.xlu0 %1324 }
 0x3db   :  { %v1327_v61 = vmul.f32 %v1325_v47, %v2591_v54 }
 0x3dd   :  { %v1329_v62 = vsub.f32 %v1318_v30, %v1327_v61 }
 0x3df   :  { %v1331_v63 = vmul.f32 %v1329_v62, %v1329_v62 }
 0x3e1   :  { %1334 = vadd.xlane.f32.xlu2 %v1331_v63 }
 0x44c   :  { %v1333_v0 = vpop.xlane.xlu1 %1332 }
 0x44d   :  { %v1336_v2 = vmul.f32 %v1333_v0, %v2591_v54 }
 0x44f   :  { %v1338_v3 = vadd.f32 1e-05, %v1336_v2 }
 0x451   :  { %1755 = vrsqrt.f32 %v1338_v3  ;;  %vm1346_vm4 = vweird.f32 %v1338_v3 }
 0x454   :  { %v1335_v4 = vpop.xlane.xlu2 %1334 }
 0x455   :  { %v1337_v5 = vmul.f32 %v1335_v4, %v2591_v54 }
 0x457   :  { %v1756_v6 = vpop.eup %1755  ;;  %v1339_v7 = vadd.f32 1e-05, %v1337_v5 }
 0x458   :  { %v1341_v8 = vmul.f32 %v1756_v6, %v1338_v3  ;;  %vm1347_vm3 = vweird.f32 %v1756_v6 }
 0x459   :  { %1757 = vrsqrt.f32 %v1339_v7  ;;  %vm1348_vm5 = vmor %vm1346_vm4, %vm1347_vm3  ;;  %vm1356_vm7 = vweird.f32 %v1339_v7 }
 0x45a   :  { %v1342_v9 = vmul.f32 %v1756_v6, %v1341_v8 }
 0x45c   :  { %v1343_v10 = vmul.f32 0.5, %v1342_v9 }
 0x45e   :  { %v1344_v11 = vsub.f32 1.5, %v1343_v10 }
 0x45f   :  { %v1758_v12 = vpop.eup %1757 }
 0x460   :  { %v1345_v13 = vmul.f32 %v1756_v6, %v1344_v11  ;;  %v1351_v14 = vmul.f32 %v1758_v12, %v1339_v7  ;;  %vm1357_vm6 = vweird.f32 %v1758_v12 }
 0x461   :  { %vm1358_vm8 = vmor %vm1356_vm7, %vm1357_vm6 }
 0x462   :  { %v1349_v16 = vsel %vm1348_vm5, %v1756_v6, %v1345_v13  ;;  %v1352_v17 = vmul.f32 %v1758_v12, %v1351_v14 }
 0x463   :  { %v1360_v54 = vmul.f32 %v1349_v16, %v1328_v59 }
 0x464   :  { %v1353_v19 = vmul.f32 0.5, %v1352_v17 }
 0x465   :  { %v1365_v20 = vmul.f32 %v1743_v15, %v1360_v54 }
 0x466   :  { %v1354_v21 = vsub.f32 1.5, %v1353_v19 }
 0x467   :  { %v1370_v22 = vadd.f32 %v1744_v18, %v1365_v20 }
 0x468   :  { %v1355_v23 = vmul.f32 %v1758_v12, %v1354_v21 }
 0x469   :  { %v1372_v24 = vmax.f32 %v1370_v22, 0.0 }
 0x46a   :  { %v1359_v25 = vsel %vm1358_vm8, %v1758_v12, %v1355_v23 }
 0x46b   :  { %v1361_v27 = vmul.f32 %v1359_v25, %v1329_v62  ;;  %1374 = vst [vmem:[#allocation13] sm:$0xff] %v1372_v24 }
 0x46d   :  { %v1366_v28 = vmul.f32 %v1743_v15, %v1361_v27 }
 0x46f   :  { %v1371_v29 = vadd.f32 %v1744_v18, %v1366_v28 }
 0x471   :  { %v1373_v31 = vmax.f32 %v1371_v29, 0.0 }
 0x473   :  { %1375 = vst [vmem:[#allocation13 + $0x8] sm:$0xff] %v1373_v31 }
 0x474   :  { %1388 = dma.vmem_to_hbm [thread:$0]  %s1381_s19, 256, %s1383_s23, [#allocation5], %s2812_s0, %s2812_s0, %s2811_s7  }
 0x475   :  { %1891 = dma.done.wait [#allocation5], 256  }
 0x476   :  { %1892 = vsyncadd [#allocation5], 4294967040 }
 0x477   :  { %1393 = vsyncpa [#allocation4], 1 }
 0x478   :  { %1394 = vsyncpa [#allocation11], 1 }
 0x479   :  { %1395 = vsyncpa [#allocation5], 1 }
 0x47a   :  { %1396 = vsyncpa [#allocation6], 1 }
 0x47b   :  { %1397 = vsyncpa [#allocation8], 1 }

</bundles_post_ra>
